<compile_context>
chip_gen: v7x
topology: tpu7x:2x2x1
jax: 0.10.0
libtpu: 0.0.40
codegen_flags: <defaults>
</compile_context>

<pallas_src>
import jax
import jax.numpy as jnp
import numpy as np
from jax.experimental import pallas as pl
from jax.experimental.pallas import tpu as pltpu


def gatgnn_kernel(x_ref, adj_ref, w1_ref, b1_ref, ablk_ref, w2_ref, b2_ref,
                  pool_ref, out_ref):
    HC, H2 = ablk_ref.shape
    H = H2 // 2
    C = HC // H

    x = x_ref[...]                      # [N, F_in]
    adj = adj_ref[...]                  # [N, N], adj[i, j] = 1 iff edge j -> i
    edge_mask = adj > 0.0

    # ---- GATConv: linear projection for all heads (one matmul) ----
    x1 = jnp.dot(x, w1_ref[...], preferred_element_type=jnp.float32)       # [N, H*C]

    # Attention logits for every head with ONE matmul against a block-diagonal matrix:
    #   e[:, h]     = <x1[:, h*C:(h+1)*C], att_src[h]>   (source contribution)
    #   e[:, H + h] = <x1[:, h*C:(h+1)*C], att_dst[h]>   (target contribution)
    e = jnp.dot(x1, ablk_ref[...], preferred_element_type=jnp.float32)     # [N, 2H]
    eT = e.T                                                               # [2H, N]

    # Raw scores per head (broadcast add), LeakyReLU(0.2), mask non-edges.
    s_list = []
    for h in range(H):
        s_h = e[:, H + h:H + h + 1] + eT[h:h + 1, :]      # s[i, j] = e_dst[i] + e_src[j]
        s_h = jnp.where(s_h > 0.0, s_h, 0.2 * s_h)        # LeakyReLU(0.2)
        s_list.append(jnp.where(edge_mask, s_h, -1e30))   # mask non-edges
    s = jnp.stack(s_list, axis=0)                         # [H, N, N]

    # One fused softmax over incoming edges (source axis) for all heads.
    # (exp(-1e30 - m) underflows to 0, so no extra `* adj` is needed.  Rows with no
    #  incoming edge never occur here because adj always contains self-loops.)
    m = jnp.max(s, axis=-1, keepdims=True)                # [H, N, 1]
    p = jnp.exp(s - m)                                    # [H, N, N]
    denom = jnp.sum(p, axis=-1, keepdims=True)            # [H, N, 1]
    attn = p * pl.reciprocal(denom, approx=True)          # [H, N, N]

    # Per-head aggregation (real MXU matmuls); heads concatenated in registers, no
    # scratch / no masked partial stores.
    heads = [
        jnp.dot(attn[h], x1[:, h * C:(h + 1) * C], preferred_element_type=jnp.float32)
        for h in range(H)
    ]
    gat = jnp.concatenate(heads, axis=-1) + b1_ref[...]   # [N, H*C] (bias after concat)
    gat = jnp.maximum(gat, 0.0)                           # ReLU

    # ---- GCNConv: D^-1/2 A D^-1/2 (gat W2) + b2  (adj symmetric, self-loops included;
    # degree computed once, ahat never materialized) ----
    deg = jnp.sum(adj, axis=-1, keepdims=True)            # [N, 1]
    dinv = jax.lax.rsqrt(deg)
    h2 = jnp.dot(gat, w2_ref[...], preferred_element_type=jnp.float32)      # [N, F_out]
    x2 = dinv * jnp.dot(adj, dinv * h2, preferred_element_type=jnp.float32) + b2_ref[...]

    # ---- global_mean_pool ----
    out_ref[...] = jnp.dot(pool_ref[...], x2, preferred_element_type=jnp.float32)


def _att_block_matrix(att_src, att_dst):
    """Block-diagonal [H*C, 2H] matrix so x1 @ ablk gives all per-head logits at once."""
    H, C = att_src.shape
    eye = jnp.eye(H, dtype=att_src.dtype)                                   # [H, H]
    src_blk = (att_src[:, :, None] * eye[:, None, :]).reshape(H * C, H)
    dst_blk = (att_dst[:, :, None] * eye[:, None, :]).reshape(H * C, H)
    return jnp.concatenate([src_blk, dst_blk], axis=1)                      # [H*C, 2H]


def gatgnn_pallas(x, adj, W1, b1, att_src, att_dst, W2, b2, pool):
    N, F_in = x.shape
    H, C = att_src.shape
    G = pool.shape[0]
    F_out = W2.shape[1]
    ablk = _att_block_matrix(att_src, att_dst)

    flops = 2 * (N * F_in * H * C        # x @ W1
                 + N * H * C * 2 * H     # x1 @ ablk
                 + H * N * N * C         # attn @ x1_head (all heads)
                 + N * H * C * F_out     # gat @ W2
                 + N * N * F_out         # adj @ h2
                 + G * N * F_out)        # pool @ x2
    transcendentals = H * N * N + H * N + N                 # exp + reciprocal + rsqrt
    bytes_accessed = 4 * (x.size + adj.size + W1.size + b1.size + ablk.size
                          + W2.size + b2.size + pool.size + G * F_out)

    # NOTE: at this toy size (N=64) everything fits comfortably in VMEM as full-array
    # blocks.  For production graph sizes the dense adjacency should be row-tiled with a
    # grid over target-node tiles marked "parallel" (megacore / v7x dual-TC) and an
    # explicit vmem_limit_bytes on v5e.
    vmem = pl.BlockSpec(memory_space=pltpu.MemorySpace.VMEM)
    return pl.pallas_call(
        gatgnn_kernel,
        out_shape=jax.ShapeDtypeStruct((G, F_out), jnp.float32),
        in_specs=[vmem] * 8,
        out_specs=vmem,
        cost_estimate=pl.CostEstimate(flops=flops,
                                      transcendentals=transcendentals,
                                      bytes_accessed=bytes_accessed),
    )(x, adj, W1, b1, ablk, W2, b2, pool)


def gatgnn_reference(x, adj, W1, b1, att_src, att_dst, W2, b2, pool):
    """Pure-JAX reference of the same dense formulation (mirrors PyG semantics)."""
    N = x.shape[0]
    H, C = att_src.shape
    x1 = (x @ W1).reshape(N, H, C)
    e_src = jnp.einsum('nhc,hc->nh', x1, att_src)          # source contribution
    e_dst = jnp.einsum('nhc,hc->nh', x1, att_dst)          # target contribution
    s = e_dst.T[:, :, None] + e_src.T[:, None, :]          # [H, N_tgt, N_src]
    s = jnp.where(s > 0, s, 0.2 * s)
    s = jnp.where((adj > 0)[None], s, -jnp.inf)
    attn = jax.nn.softmax(s, axis=-1)
    gat = jnp.einsum('hij,jhc->ihc', attn, x1).reshape(N, H * C)
    gat = jax.nn.relu(gat + b1)
    deg = adj.sum(axis=1)
    dinv = 1.0 / jnp.sqrt(deg)
    ahat = dinv[:, None] * adj * dinv[None, :]
    x2 = ahat @ (gat @ W2) + b2
    return pool @ x2


if __name__ == "__main__":
    # small, deterministic problem
    N = 64            # total nodes (2 graphs x 32 nodes)
    G = 2             # graphs in the batch
    F_IN = 16         # in_channels
    HID = 16          # hidden_channels (per head)
    HEADS = 4
    F_OUT = 32        # out_channels

    key = jax.random.PRNGKey(0)
    k = jax.random.split(key, 7)
    x = jax.random.normal(k[0], (N, F_IN), jnp.float32)
    W1 = 0.1 * jax.random.normal(k[1], (F_IN, HEADS * HID), jnp.float32)
    b1 = 0.1 * jax.random.normal(k[2], (1, HEADS * HID), jnp.float32)
    att_src = 0.1 * jax.random.normal(k[3], (HEADS, HID), jnp.float32)
    att_dst = 0.1 * jax.random.normal(k[4], (HEADS, HID), jnp.float32)
    W2 = 0.1 * jax.random.normal(k[5], (HEADS * HID, F_OUT), jnp.float32)
    b2 = 0.1 * jax.random.normal(k[6], (1, F_OUT), jnp.float32)

    # Build an undirected ring graph per batch element + self loops (dense adjacency),
    # and the mean-pool matrix from the batch assignment.
    npg = N // G
    adj_np = np.zeros((N, N), np.float32)
    pool_np = np.zeros((G, N), np.float32)
    for g in range(G):
        base = g * npg
        for i in range(npg):
            j = (i + 1) % npg
            adj_np[base + i, base + j] = 1.0
            adj_np[base + j, base + i] = 1.0
            adj_np[base + i, base + i] = 1.0        # self loop (GAT/GCN add_self_loops)
        pool_np[g, base:base + npg] = 1.0 / npg
    adj = jnp.asarray(adj_np)
    pool = jnp.asarray(pool_np)

    out = gatgnn_pallas(x, adj, W1, b1, att_src, att_dst, W2, b2, pool)
    out = jax.block_until_ready(out)

    ref = gatgnn_reference(x, adj, W1, b1, att_src, att_dst, W2, b2, pool)
    np.testing.assert_allclose(np.asarray(out), np.asarray(ref), rtol=1e-2, atol=1e-3)

    print("KERNEL_OK")
</pallas_src>

<mosaic_0001>
module attributes {stable_mosaic.version = 11 : i64} {
  func.func @gatgnn_kernel(%arg0: memref<64x16xf32, #tpu.memory_space<vmem>>, %arg1: memref<64x64xf32, #tpu.memory_space<vmem>>, %arg2: memref<16x64xf32, #tpu.memory_space<vmem>>, %arg3: memref<1x64xf32, #tpu.memory_space<vmem>>, %arg4: memref<64x8xf32, #tpu.memory_space<vmem>>, %arg5: memref<64x32xf32, #tpu.memory_space<vmem>>, %arg6: memref<1x32xf32, #tpu.memory_space<vmem>>, %arg7: memref<2x64xf32, #tpu.memory_space<vmem>>, %arg8: memref<2x32xf32, #tpu.memory_space<vmem>>) attributes {dimension_semantics = [], scalar_prefetch = 0 : i64, scratch_operands = 0 : i64, tpu.core_type = #tpu.core_type<tc>} {
    %c0 = arith.constant 0 : index
    %c0_0 = arith.constant 0 : index
    %0 = vector.load %arg0[%c0, %c0_0] : memref<64x16xf32, #tpu.memory_space<vmem>>, vector<64x16xf32>
    %c0_1 = arith.constant 0 : index
    %c0_2 = arith.constant 0 : index
    %1 = vector.load %arg1[%c0_1, %c0_2] : memref<64x64xf32, #tpu.memory_space<vmem>>, vector<64x64xf32>
    %cst = arith.constant 0.000000e+00 : f32
    %2 = vector.broadcast %cst : f32 to vector<64x64xf32>
    %3 = arith.cmpf ogt, %1, %2 : vector<64x64xf32>
    %c0_3 = arith.constant 0 : index
    %c0_4 = arith.constant 0 : index
    %4 = vector.load %arg2[%c0_3, %c0_4] : memref<16x64xf32, #tpu.memory_space<vmem>>, vector<16x64xf32>
    %cst_5 = arith.constant dense<0.000000e+00> : vector<64x64xf32>
    %5 = tpu.matmul %0, %4, %cst_5 {dimension_numbers = #tpu.dot_dimension_numbers<[1], [0], [0], [1], [0, 0, 1, 1], [], []>} : vector<64x16xf32>, vector<16x64xf32>, vector<64x64xf32> -> vector<64x64xf32>
    %c0_6 = arith.constant 0 : index
    %c0_7 = arith.constant 0 : index
    %6 = vector.load %arg4[%c0_6, %c0_7] : memref<64x8xf32, #tpu.memory_space<vmem>>, vector<64x8xf32>
    %cst_8 = arith.constant dense<0.000000e+00> : vector<64x8xf32>
    %7 = tpu.matmul %5, %6, %cst_8 {dimension_numbers = #tpu.dot_dimension_numbers<[1], [0], [0], [1], [0, 0, 1, 1], [], []>} : vector<64x64xf32>, vector<64x8xf32>, vector<64x8xf32> -> vector<64x8xf32>
    %8 = tpu.transpose %7, [1, 0] : vector<64x8xf32> -> vector<8x64xf32>
    %9 = vector.extract_strided_slice %7 {offsets = [0, 4], sizes = [64, 1], strides = [1, 1]} : vector<64x8xf32> to vector<64x1xf32>
    %10 = vector.extract_strided_slice %8 {offsets = [0, 0], sizes = [1, 64], strides = [1, 1]} : vector<8x64xf32> to vector<1x64xf32>
    %11 = vector.broadcast %9 : vector<64x1xf32> to vector<64x64xf32>
    %12 = vector.broadcast %10 : vector<1x64xf32> to vector<64x64xf32>
    %13 = arith.addf %11, %12 : vector<64x64xf32>
    %cst_9 = arith.constant 0.000000e+00 : f32
    %14 = vector.broadcast %cst_9 : f32 to vector<64x64xf32>
    %15 = arith.cmpf ogt, %13, %14 : vector<64x64xf32>
    %cst_10 = arith.constant 2.000000e-01 : f32
    %16 = vector.broadcast %cst_10 : f32 to vector<64x64xf32>
    %17 = arith.mulf %16, %13 : vector<64x64xf32>
    %18 = arith.select %15, %13, %17 : vector<64x64xi1>, vector<64x64xf32>
    %cst_11 = arith.constant -1.000000e+30 : f32
    %19 = vector.broadcast %cst_11 : f32 to vector<64x64xf32>
    %20 = arith.select %3, %18, %19 : vector<64x64xi1>, vector<64x64xf32>
    %21 = vector.extract_strided_slice %7 {offsets = [0, 5], sizes = [64, 1], strides = [1, 1]} : vector<64x8xf32> to vector<64x1xf32>
    %22 = vector.extract_strided_slice %8 {offsets = [1, 0], sizes = [1, 64], strides = [1, 1]} : vector<8x64xf32> to vector<1x64xf32>
    %23 = vector.broadcast %21 : vector<64x1xf32> to vector<64x64xf32>
    %24 = vector.broadcast %22 : vector<1x64xf32> to vector<64x64xf32>
    %25 = arith.addf %23, %24 : vector<64x64xf32>
    %cst_12 = arith.constant 0.000000e+00 : f32
    %26 = vector.broadcast %cst_12 : f32 to vector<64x64xf32>
    %27 = arith.cmpf ogt, %25, %26 : vector<64x64xf32>
    %cst_13 = arith.constant 2.000000e-01 : f32
    %28 = vector.broadcast %cst_13 : f32 to vector<64x64xf32>
    %29 = arith.mulf %28, %25 : vector<64x64xf32>
    %30 = arith.select %27, %25, %29 : vector<64x64xi1>, vector<64x64xf32>
    %cst_14 = arith.constant -1.000000e+30 : f32
    %31 = vector.broadcast %cst_14 : f32 to vector<64x64xf32>
    %32 = arith.select %3, %30, %31 : vector<64x64xi1>, vector<64x64xf32>
    %33 = vector.extract_strided_slice %7 {offsets = [0, 6], sizes = [64, 1], strides = [1, 1]} : vector<64x8xf32> to vector<64x1xf32>
    %34 = vector.extract_strided_slice %8 {offsets = [2, 0], sizes = [1, 64], strides = [1, 1]} : vector<8x64xf32> to vector<1x64xf32>
    %35 = vector.broadcast %33 : vector<64x1xf32> to vector<64x64xf32>
    %36 = vector.broadcast %34 : vector<1x64xf32> to vector<64x64xf32>
    %37 = arith.addf %35, %36 : vector<64x64xf32>
    %cst_15 = arith.constant 0.000000e+00 : f32
    %38 = vector.broadcast %cst_15 : f32 to vector<64x64xf32>
    %39 = arith.cmpf ogt, %37, %38 : vector<64x64xf32>
    %cst_16 = arith.constant 2.000000e-01 : f32
    %40 = vector.broadcast %cst_16 : f32 to vector<64x64xf32>
    %41 = arith.mulf %40, %37 : vector<64x64xf32>
    %42 = arith.select %39, %37, %41 : vector<64x64xi1>, vector<64x64xf32>
    %cst_17 = arith.constant -1.000000e+30 : f32
    %43 = vector.broadcast %cst_17 : f32 to vector<64x64xf32>
    %44 = arith.select %3, %42, %43 : vector<64x64xi1>, vector<64x64xf32>
    %45 = vector.extract_strided_slice %7 {offsets = [0, 7], sizes = [64, 1], strides = [1, 1]} : vector<64x8xf32> to vector<64x1xf32>
    %46 = vector.extract_strided_slice %8 {offsets = [3, 0], sizes = [1, 64], strides = [1, 1]} : vector<8x64xf32> to vector<1x64xf32>
    %47 = vector.broadcast %45 : vector<64x1xf32> to vector<64x64xf32>
    %48 = vector.broadcast %46 : vector<1x64xf32> to vector<64x64xf32>
    %49 = arith.addf %47, %48 : vector<64x64xf32>
    %cst_18 = arith.constant 0.000000e+00 : f32
    %50 = vector.broadcast %cst_18 : f32 to vector<64x64xf32>
    %51 = arith.cmpf ogt, %49, %50 : vector<64x64xf32>
    %cst_19 = arith.constant 2.000000e-01 : f32
    %52 = vector.broadcast %cst_19 : f32 to vector<64x64xf32>
    %53 = arith.mulf %52, %49 : vector<64x64xf32>
    %54 = arith.select %51, %49, %53 : vector<64x64xi1>, vector<64x64xf32>
    %cst_20 = arith.constant -1.000000e+30 : f32
    %55 = vector.broadcast %cst_20 : f32 to vector<64x64xf32>
    %56 = arith.select %3, %54, %55 : vector<64x64xi1>, vector<64x64xf32>
    %57 = vector.shape_cast %20 : vector<64x64xf32> to vector<1x64x64xf32>
    %58 = vector.shape_cast %32 : vector<64x64xf32> to vector<1x64x64xf32>
    %59 = vector.shape_cast %44 : vector<64x64xf32> to vector<1x64x64xf32>
    %60 = vector.shape_cast %56 : vector<64x64xf32> to vector<1x64x64xf32>
    %61 = tpu.concatenate %57, %58, %59, %60 in 0 : vector<1x64x64xf32>, vector<1x64x64xf32>, vector<1x64x64xf32>, vector<1x64x64xf32> -> vector<4x64x64xf32>
    %cst_21 = arith.constant dense<0xFF800000> : vector<4x64xf32>
    %62 = vector.multi_reduction <maximumf>, %61, %cst_21 [2] : vector<4x64x64xf32> to vector<4x64xf32>
    %63 = vector.shape_cast %62 : vector<4x64xf32> to vector<4x64x1xf32>
    %64 = vector.broadcast %63 : vector<4x64x1xf32> to vector<4x64x64xf32>
    %65 = arith.subf %61, %64 : vector<4x64x64xf32>
    %66 = math.exp %65 : vector<4x64x64xf32>
    %cst_22 = arith.constant dense<0.000000e+00> : vector<4x64xf32>
    %67 = vector.multi_reduction <add>, %66, %cst_22 [2] : vector<4x64x64xf32> to vector<4x64xf32>
    %68 = vector.shape_cast %67 : vector<4x64xf32> to vector<4x64x1xf32>
    %69 = tpu.reciprocal %68 {approx = true} : vector<4x64x1xf32> -> vector<4x64x1xf32>
    %70 = vector.broadcast %69 : vector<4x64x1xf32> to vector<4x64x64xf32>
    %71 = arith.mulf %66, %70 : vector<4x64x64xf32>
    %72 = vector.extract_strided_slice %71 {offsets = [0, 0, 0], sizes = [1, 64, 64], strides = [1, 1, 1]} : vector<4x64x64xf32> to vector<1x64x64xf32>
    %73 = vector.shape_cast %72 : vector<1x64x64xf32> to vector<64x64xf32>
    %74 = vector.extract_strided_slice %5 {offsets = [0, 0], sizes = [64, 16], strides = [1, 1]} : vector<64x64xf32> to vector<64x16xf32>
    %cst_23 = arith.constant dense<0.000000e+00> : vector<64x16xf32>
    %75 = tpu.matmul %73, %74, %cst_23 {dimension_numbers = #tpu.dot_dimension_numbers<[1], [0], [0], [1], [0, 0, 1, 1], [], []>} : vector<64x64xf32>, vector<64x16xf32>, vector<64x16xf32> -> vector<64x16xf32>
    %76 = vector.extract_strided_slice %71 {offsets = [1, 0, 0], sizes = [1, 64, 64], strides = [1, 1, 1]} : vector<4x64x64xf32> to vector<1x64x64xf32>
    %77 = vector.shape_cast %76 : vector<1x64x64xf32> to vector<64x64xf32>
    %78 = vector.extract_strided_slice %5 {offsets = [0, 16], sizes = [64, 16], strides = [1, 1]} : vector<64x64xf32> to vector<64x16xf32>
    %cst_24 = arith.constant dense<0.000000e+00> : vector<64x16xf32>
    %79 = tpu.matmul %77, %78, %cst_24 {dimension_numbers = #tpu.dot_dimension_numbers<[1], [0], [0], [1], [0, 0, 1, 1], [], []>} : vector<64x64xf32>, vector<64x16xf32>, vector<64x16xf32> -> vector<64x16xf32>
    %80 = vector.extract_strided_slice %71 {offsets = [2, 0, 0], sizes = [1, 64, 64], strides = [1, 1, 1]} : vector<4x64x64xf32> to vector<1x64x64xf32>
    %81 = vector.shape_cast %80 : vector<1x64x64xf32> to vector<64x64xf32>
    %82 = vector.extract_strided_slice %5 {offsets = [0, 32], sizes = [64, 16], strides = [1, 1]} : vector<64x64xf32> to vector<64x16xf32>
    %cst_25 = arith.constant dense<0.000000e+00> : vector<64x16xf32>
    %83 = tpu.matmul %81, %82, %cst_25 {dimension_numbers = #tpu.dot_dimension_numbers<[1], [0], [0], [1], [0, 0, 1, 1], [], []>} : vector<64x64xf32>, vector<64x16xf32>, vector<64x16xf32> -> vector<64x16xf32>
    %84 = vector.extract_strided_slice %71 {offsets = [3, 0, 0], sizes = [1, 64, 64], strides = [1, 1, 1]} : vector<4x64x64xf32> to vector<1x64x64xf32>
    %85 = vector.shape_cast %84 : vector<1x64x64xf32> to vector<64x64xf32>
    %86 = vector.extract_strided_slice %5 {offsets = [0, 48], sizes = [64, 16], strides = [1, 1]} : vector<64x64xf32> to vector<64x16xf32>
    %cst_26 = arith.constant dense<0.000000e+00> : vector<64x16xf32>
    %87 = tpu.matmul %85, %86, %cst_26 {dimension_numbers = #tpu.dot_dimension_numbers<[1], [0], [0], [1], [0, 0, 1, 1], [], []>} : vector<64x64xf32>, vector<64x16xf32>, vector<64x16xf32> -> vector<64x16xf32>
    %88 = tpu.concatenate %75, %79, %83, %87 in 1 : vector<64x16xf32>, vector<64x16xf32>, vector<64x16xf32>, vector<64x16xf32> -> vector<64x64xf32>
    %c0_27 = arith.constant 0 : index
    %c0_28 = arith.constant 0 : index
    %89 = vector.load %arg3[%c0_27, %c0_28] : memref<1x64xf32, #tpu.memory_space<vmem>>, vector<1x64xf32>
    %90 = vector.broadcast %89 : vector<1x64xf32> to vector<64x64xf32>
    %91 = arith.addf %88, %90 : vector<64x64xf32>
    %cst_29 = arith.constant 0.000000e+00 : f32
    %92 = vector.broadcast %cst_29 : f32 to vector<64x64xf32>
    %93 = arith.maximumf %91, %92 : vector<64x64xf32>
    %cst_30 = arith.constant dense<0.000000e+00> : vector<64xf32>
    %94 = vector.multi_reduction <add>, %1, %cst_30 [1] : vector<64x64xf32> to vector<64xf32>
    %95 = vector.shape_cast %94 : vector<64xf32> to vector<64x1xf32>
    %96 = math.rsqrt %95 : vector<64x1xf32>
    %c0_31 = arith.constant 0 : index
    %c0_32 = arith.constant 0 : index
    %97 = vector.load %arg5[%c0_31, %c0_32] : memref<64x32xf32, #tpu.memory_space<vmem>>, vector<64x32xf32>
    %cst_33 = arith.constant dense<0.000000e+00> : vector<64x32xf32>
    %98 = tpu.matmul %93, %97, %cst_33 {dimension_numbers = #tpu.dot_dimension_numbers<[1], [0], [0], [1], [0, 0, 1, 1], [], []>} : vector<64x64xf32>, vector<64x32xf32>, vector<64x32xf32> -> vector<64x32xf32>
    %99 = vector.broadcast %96 : vector<64x1xf32> to vector<64x32xf32>
    %100 = arith.mulf %99, %98 : vector<64x32xf32>
    %cst_34 = arith.constant dense<0.000000e+00> : vector<64x32xf32>
    %101 = tpu.matmul %1, %100, %cst_34 {dimension_numbers = #tpu.dot_dimension_numbers<[1], [0], [0], [1], [0, 0, 1, 1], [], []>} : vector<64x64xf32>, vector<64x32xf32>, vector<64x32xf32> -> vector<64x32xf32>
    %102 = vector.broadcast %96 : vector<64x1xf32> to vector<64x32xf32>
    %103 = arith.mulf %102, %101 : vector<64x32xf32>
    %c0_35 = arith.constant 0 : index
    %c0_36 = arith.constant 0 : index
    %104 = vector.load %arg6[%c0_35, %c0_36] : memref<1x32xf32, #tpu.memory_space<vmem>>, vector<1x32xf32>
    %105 = vector.broadcast %104 : vector<1x32xf32> to vector<64x32xf32>
    %106 = arith.addf %103, %105 : vector<64x32xf32>
    %c0_37 = arith.constant 0 : index
    %c0_38 = arith.constant 0 : index
    %107 = vector.load %arg7[%c0_37, %c0_38] : memref<2x64xf32, #tpu.memory_space<vmem>>, vector<2x64xf32>
    %cst_39 = arith.constant dense<0.000000e+00> : vector<2x32xf32>
    %108 = tpu.matmul %107, %106, %cst_39 {dimension_numbers = #tpu.dot_dimension_numbers<[1], [0], [0], [1], [0, 0, 1, 1], [], []>} : vector<2x64xf32>, vector<64x32xf32>, vector<2x32xf32> -> vector<2x32xf32>
    %c0_40 = arith.constant 0 : index
    %c0_41 = arith.constant 0 : index
    %109 = vector.load %arg8[%c0_40, %c0_41] : memref<2x32xf32, #tpu.memory_space<vmem>>, vector<2x32xf32>
    tpu.vector_store %arg8[%c0_40, %c0_41], %108 {strides = array<i32>} : memref<2x32xf32, #tpu.memory_space<vmem>>, vector<2x32xf32>,
    return
  }
}

</mosaic_0001>

<bundles_post_ra>
// kernel: tpu_custom_call.1
= control target key start
LH: loop header
LB: loop body
LE: loop exit
PB: predicated region body
PF: predicated region fallthrough
CT: control target
= control target key end

     0   :  { %vm56_vm0 = vcmask 130048   ;;  %s3998_s0 = inlined_call_operand.vmem [shape: f32[64,16], index: 0, kind: input, shape index: {}]   ;;  %s3999_s1 = inlined_call_operand.vmem [shape: f32[64,64], index: 1, kind: input, shape index: {}]   ;;  %s4000_s2 = inlined_call_operand.vmem [shape: f32[16,64], index: 2, kind: input, shape index: {}]   ;;  %s4001_s3 = inlined_call_operand.vmem [shape: f32[1,64], index: 3, kind: input, shape index: {}]   ;;  %s4002_s4 = inlined_call_operand.vmem [shape: f32[64,8], index: 4, kind: input, shape index: {}]   ;;  %s4003_s5 = inlined_call_operand.vmem [shape: f32[64,32], index: 5, kind: input, shape index: {}]   ;;  %s4004_s6 = inlined_call_operand.vmem [shape: f32[1,32], index: 6, kind: input, shape index: {}]   ;;  %s4005_s7 = inlined_call_operand.vmem [shape: f32[2,64], index: 7, kind: input, shape index: {}]   ;;  %s4006_s8 = inlined_call_operand.hbm [shape: f32[2,32], index: 8, kind: output, shape index: {}]  }
   0x1   :  { %v54_v0 = vld [vmem:[%s4000_s2] sm:$0xff]  ;;  %v55_v1 = vld [vmem:[%s4000_s2 + $0x8] sm:$0xff]  ;;  %v188_v8 = vld [vmem:[%s4002_s4 + $0x10] sm:$0xff] }
   0x2   :  { %v30_v2 = vld [vmem:[%s3998_s0] sm:$0xff]  ;;  %v2601_v3 = vpack.c.bf16 %v55_v1, %v54_v0  ;;  %v187_v5 = vld [vmem:[%s4002_s4 + $0x8] sm:$0xff]  ;;  %v189_v9 = vld [vmem:[%s4002_s4 + $0x18] sm:$0xff] }
   0x3   :  { %2374 = vmatprep.mubr.msk.f32.mxu0 %vm56_vm0, %v30_v2  ;;  %v186_v4 = vld [vmem:[%s4002_s4] sm:$0xff]  ;;  %v31_v6 = vld [vmem:[%s3998_s0 + $0x8] sm:$0xff]  ;;  %v32_v10 = vld [vmem:[%s3998_s0 + $0x10] sm:$0xff]  ;;  %v2609_v11 = vpack.c.bf16 %v189_v9, %v188_v8 }
   0x4   :  { %2602 = vmatprep.subr.bf16.mxu0 %v2601_v3  ;;  %v2605_v7 = vpack.c.bf16 %v187_v5, %v186_v4  ;;  %v190_v12 = vld [vmem:[%s4002_s4 + $0x20] sm:$0xff]  ;;  %v191_v13 = vld [vmem:[%s4002_s4 + $0x28] sm:$0xff] }
   0x5   :  { %2604 = vmatpush3.bf16.msra.mxu0 %v2601_v3 }
   0x6   :  { %2606 = vmatprep.subr.bf16.mxu1 %v2605_v7 }
   0x7   :  { %13 = vsyncpa [#allocation3], 0  ;;  %2608 = vmatpush3.bf16.msra.mxu1 %v2605_v7  ;;  %v33_v14 = vld [vmem:[%s3998_s0 + $0x18] sm:$0xff]  ;;  %v2613_v15 = vpack.c.bf16 %v191_v13, %v190_v12  ;;  %v34_v16 = vld [vmem:[%s3998_s0 + $0x20] sm:$0xff]  ;;  %vm194_vm1 = vcmask 523264   ;;  %s3011_s16 = smov 96  }
   0x8   :  { %2375 = vmatmul.mubr.msk.f32.vlgmr.msra.gmra.mrb[0].mxu0 %vm56_vm0, %v31_v6  ;;  %2610 = vmatprep.subr.bf16.mxu1 %v2609_v11  ;;  %v192_v17 = vld [vmem:[%s4002_s4 + $0x30] sm:$0xff]  ;;  %v193_v18 = vld [vmem:[%s4002_s4 + $0x38] sm:$0xff]  ;;  %v35_v19 = vld [vmem:[%s3998_s0 + $0x28] sm:$0xff]  ;;  %s3012_s17 = smov 112   ;;  %v3014_v39 = vmov 5   ;;  %v3015_v40 = vmov 4  }
   0x9   :  { %2377 = vmatprep.mubr.msk.f32.mxu0 %vm56_vm0, %v32_v10  ;;  %v2617_v20 = vpack.c.bf16 %v193_v18, %v192_v17  ;;  %v36_v21 = vld [vmem:[%s3998_s0 + $0x30] sm:$0xff]  ;;  %v37_v22 = vld [vmem:[%s3998_s0 + $0x38] sm:$0xff]  ;;  %s3013_s0 = smov 80   ;;  %2784 = vset.pattern.permute.xlu1 %v3014_v39  ;;  %v3016_v6 = vmov 6   ;;  %v3017_v7 = vmov 7   ;;  %s3018_s14 = smov 16  }
   0xa   :  { %2783 = vset.pattern.permute.xlu0 %v3015_v40  ;;  %s3019_s24 = smov 32   ;;  %s3020_s29 = smov 48  }
   0xb   :  { %2612 = vmatpush3.bf16.msra.mxu1 %v2609_v11  ;;  %s3024_s21 = smov [#allocation2]  }
   0xc   :  { %2378 = vmatmul.mubr.msk.f32.gmra.mrb[2].mxu0 %vm56_vm0, %v33_v14  ;;  %2614 = vmatprep.subr.bf16.mxu1 %v2613_v15  ;;  %s2164_s22 = sshll.u32 %s3024_s21, 4  ;;  %s2165_s22 = int_to_ptr.vmem [resolvable:$true] %s2164_s22 }
   0xd   :  { %2380 = vmatprep.mubr.msk.f32.mxu0 %vm56_vm0, %v34_v16  ;;  %s2987_s23 = scalar_lea.vmem %s2165_s22, 32  ;;  %p2992_p1 = scmp.lt.s32.totalorder %s2165_s22, %s2165_s22 }
   0xe   :  { %p2988_p0 = scmp.ne.s32.totalorder %s2165_s22, %s2987_s23  ;;  %p2993_p2 = scmp.lt.s32.totalorder %s2987_s23, %s2987_s23 }
   0xf   :  { %2616 = vmatpush3.bf16.msra.mxu1 %v2613_v15 }
  0x10   :  { %2381 = vmatmul.mubr.msk.f32.gmra.mrb[4].mxu0 %vm56_vm0, %v35_v19  ;;  %2618 = vmatprep.subr.bf16.mxu1 %v2617_v20  ;;  %p2994_p3 = por %p2993_p2, %p2992_p1 }
  0x11   :  { %2383 = vmatprep.mubr.msk.f32.mxu0 %vm56_vm0, %v36_v21 }
  0x12   :  { %p2995_p4 = pnand %p2994_p3, %p2988_p0 }
  0x13   :  { %2620 = vmatpush3.bf16.msra.mxu1 %v2617_v20 }
  0x14   :  { %2384 = vmatmul.mubr.msk.f32.gmra.mrb[6].mxu0 %vm56_vm0, %v37_v22 }
  0xdb   :  { %v2376_v23 = vpop.f32.mrb[0].mxu0 }
  0xdc   :  { %v147_v24 = vpop.f32.mrb[1].mxu0 }
  0xdd   :  { %2402 = vmatprep.mubr.msk.f32.mxu1 %vm194_vm1, %v147_v24  ;;  %v2748_v25 = vpack.i.bf16 %v2376_v23, %v147_v24  ;;  %v2621_v26 = vpack.c.bf16 %v2376_v23, %v147_v24 }
  0xde   :  { %2403 = vmatmul.mubr.msk.f32.vlgmr.msra.gmra.mrb[0].mxu1 %vm194_vm1, %v2376_v23 }
  0xdf   :  { %2749 = vrot.lane.b32.xlu0 %v2748_v25, %s3011_s16  ;;  %2744 = vrot.lane.b32.xlu1 %v2748_v25, %s3012_s17  ;;  %v2379_v27 = vpop.f32.mrb[2].mxu0 }
  0xe0   :  { %2622 = vmatprep.subr.bf16.mxu0 %v2621_v26  ;;  %v157_v28 = vpop.f32.mrb[3].mxu0 }
  0xe1   :  { %2624 = vmatpush3.bf16.msra.mxu0 %v2621_v26  ;;  %v2758_v29 = vpack.i.bf16 %v2379_v27, %v157_v28  ;;  %2405 = vmatprep.mubr.msk.f32.mxu1 %vm194_vm1, %v157_v28  ;;  %v2625_v30 = vpack.c.bf16 %v2379_v27, %v157_v28 }
  0xe2   :  { %2406 = vmatmul.mubr.msk.f32.gmra.mrb[2].mxu1 %vm194_vm1, %v2379_v27 }
  0xe3   :  { %2754 = vrot.lane.b32.xlu0 %v2748_v25, %s3013_s0  ;;  %2759 = vrot.lane.b32.xlu1 %v2758_v29, %s3012_s17  ;;  %v2382_v31 = vpop.f32.mrb[4].mxu0 }
  0xe4   :  { %v167_v32 = vpop.f32.mrb[5].mxu0  ;;  %2626 = vmatprep.subr.bf16.mxu0 %v2625_v30 }
  0xe5   :  { %2628 = vmatpush3.bf16.msra.mxu0 %v2625_v30  ;;  %v3140_v33 = vpack.i.bf16 %v2382_v31, %v167_v32  ;;  %2408 = vmatprep.mubr.msk.f32.mxu1 %vm194_vm1, %v167_v32  ;;  %v2629_v34 = vpack.c.bf16 %v2382_v31, %v167_v32 }
  0xe6   :  { %2409 = vmatmul.mubr.msk.f32.gmra.mrb[4].mxu1 %vm194_vm1, %v2382_v31 }
  0xe7   :  { %2764 = vrot.lane.b32.xlu1 %v2758_v29, %s3011_s16  ;;  %2774 = vrot.lane.b32.xlu0 %v3140_v33, %s3012_s17  ;;  %v2385_v35 = vpop.f32.mrb[6].mxu0 }
  0xe8   :  { %v177_v36 = vpop.f32.mrb[7].mxu0  ;;  %2630 = vmatprep.subr.bf16.mxu0 %v2629_v34 }
  0xe9   :  { %v3147_v37 = vpack.i.bf16 %v2385_v35, %v177_v36  ;;  %2632 = vmatpush3.bf16.msra.mxu0 %v2629_v34  ;;  %2411 = vmatprep.mubr.msk.f32.mxu1 %vm194_vm1, %v177_v36  ;;  %v2633_v38 = vpack.c.bf16 %v2385_v35, %v177_v36 }
  0xea   :  { %2412 = vmatmul.mubr.msk.f32.gmra.mrb[6].mxu1 %vm194_vm1, %v2385_v35  ;;  %v396_v35 = vlaneseq }
  0xeb   :  { %2769 = vrot.lane.b32.xlu1 %v2758_v29, %s3013_s0  ;;  %2634 = vmatprep.subr.bf16.mxu0 %v2633_v38 }
  0xed   :  { %2636 = vmatpush3.bf16.msra.mxu0 %v2633_v38 }
  0xef   :  { %2779 = vrot.lane.b32.xlu1 %v3147_v37, %s3012_s17 }
 0x151   :  { %v2750_v41 = vpop.permute.xlu0 %2749  ;;  %v2745_v42 = vpop.permute.xlu1 %2744 }
 0x152   :  { %v2752_v43 = vunpack.i.h.bf16 %v2750_v41  ;;  %v2751_v44 = vunpack.i.l.bf16 %v2750_v41  ;;  %v2747_v45 = vunpack.i.h.bf16 %v2745_v42  ;;  %v2746_v46 = vunpack.i.l.bf16 %v2745_v42 }
 0x154   :  { %v2637_v47 = vpack.c.bf16 %v2747_v45, %v2746_v46  ;;  %v3156_v48 = vpack.c.bf16 %v2752_v43, %v2751_v44 }
 0x155   :  { %v2755_v49 = vpop.permute.xlu0 %2754  ;;  %v2760_v50 = vpop.permute.xlu1 %2759 }
 0x156   :  { %v2762_v51 = vunpack.i.h.bf16 %v2760_v50  ;;  %v2761_v52 = vunpack.i.l.bf16 %v2760_v50  ;;  %2638 = vmatprep.subr.bf16.mxu1 %v2637_v47  ;;  %2654 = vmatprep.subr.bf16.mxu0 %v3156_v48  ;;  %v2757_v61 = vunpack.i.h.bf16 %v2755_v49  ;;  %v2756_v62 = vunpack.i.l.bf16 %v2755_v49 }
 0x157   :  { %2640 = vmatpush3.bf16.msra.mxu1 %v2637_v47 }
 0x158   :  { %v2641_v53 = vpack.c.bf16 %v2762_v51, %v2761_v52  ;;  %v3163_v2 = vpack.c.bf16 %v2757_v61, %v2756_v62  ;;  %v39_v52 = vld [vmem:[%s3999_s1 + $0x8] sm:$0xff] }
 0x159   :  { %v3159_v54 = vpop.permute.xlu1 %2764  ;;  %v2775_v55 = vpop.permute.xlu0 %2774  ;;  %vm47_vm2 = vcmp.gt.f32.partialorder %v39_v52, 0.0 }
 0x15a   :  { %v2777_v56 = vunpack.i.h.bf16 %v2775_v55  ;;  %v2776_v57 = vunpack.i.l.bf16 %v2775_v55  ;;  %2642 = vmatprep.subr.bf16.mxu1 %v2641_v53 }
 0x15b   :  { %2644 = vmatpush3.bf16.msra.mxu1 %v2641_v53  ;;  %v3258_v53 = vld [vmem:[%s3999_s1] sm:$0xff] }
 0x15c   :  { %v2645_v58 = vpack.c.bf16 %v2777_v56, %v2776_v57  ;;  %vm46_vm3 = vcmp.gt.f32.partialorder %v3258_v53, 0.0  ;;  %v3357_v53 = vld [vmem:[%s3999_s1 + $0x38] sm:$0xff] }
 0x15d   :  { %v3161_v59 = vpop.permute.xlu1 %2769 }
 0x15e   :  { %2646 = vmatprep.subr.bf16.mxu1 %v2645_v58 }
 0x15f   :  { %2648 = vmatpush3.bf16.msra.mxu1 %v2645_v58 }
 0x161   :  { %v2780_v60 = vpop.permute.xlu1 %2779 }
 0x162   :  { %v2782_v63 = vunpack.i.h.bf16 %v2780_v60  ;;  %v2781_v0 = vunpack.i.l.bf16 %v2780_v60 }
 0x164   :  { %v2649_v1 = vpack.c.bf16 %v2782_v63, %v2781_v0 }
 0x166   :  { %2650 = vmatprep.subr.bf16.mxu1 %v2649_v1 }
 0x167   :  { %2652 = vmatpush3.bf16.msra.mxu1 %v2649_v1 }
 0x168   :  { %2670 = vmatprep.subr.bf16.mxu1 %v3163_v2 }
 0x1b1   :  { %v3166_v3 = vpop.f32.mrb[0].mxu1 }
 0x1b2   :  { %v285_v4 = vpop.f32.mrb[1].mxu1  ;;  %363 = vperm.xlu0 %2783, %v3166_v3   ;;  %445 = vperm.xlu1 %2784, %v3166_v3  }
 0x1b5   :  { %v3170_v5 = vpop.f32.mrb[2].mxu1 }
 0x1b6   :  { %2785 = vset.pattern.permute.xlu0 %v3016_v6  ;;  %2786 = vset.pattern.permute.xlu1 %v3017_v7  ;;  %v295_v8 = vpop.f32.mrb[3].mxu1 }
 0x1b7   :  { %521 = vperm.xlu0 %2785, %v3166_v3   ;;  %597 = vperm.xlu1 %2786, %v3166_v3  }
 0x1b9   :  { %v2410_v9 = vpop.f32.mrb[4].mxu1 }
 0x1ba   :  { %v305_v10 = vpop.f32.mrb[5].mxu1 }
 0x1bb   :  { %2787 = vset.pattern.permute.xlu0 %v3015_v40  ;;  %2788 = vset.pattern.permute.xlu1 %v3014_v39 }
 0x1bc   :  { %358 = vperm.xlu0 %2787, %v285_v4   ;;  %441 = vperm.xlu1 %2788, %v285_v4  }
 0x1bd   :  { %v2413_v11 = vpop.f32.mrb[6].mxu1 }
 0x1be   :  { %v315_v12 = vpop.f32.mrb[7].mxu1 }
 0x1c0   :  { %368 = vperm.xlu0 %2787, %v295_v8   ;;  %2789 = vset.pattern.permute.xlu1 %v3016_v6 }
 0x1c1   :  { %517 = vperm.xlu1 %2789, %v285_v4  }
 0x1c4   :  { %2795 = vset.pattern.permute.xlu0 %v3014_v39 }
 0x1c5   :  { %449 = vperm.xlu0 %2795, %v295_v8   ;;  %2790 = vset.pattern.permute.xlu1 %v3017_v7 }
 0x1c6   :  { %593 = vperm.xlu1 %2790, %v285_v4  }
 0x1c9   :  { %2796 = vset.pattern.permute.xlu0 %v3016_v6 }
 0x1ca   :  { %525 = vperm.xlu0 %2796, %v295_v8   ;;  %2791 = vset.pattern.permute.xlu1 %v3015_v40 }
 0x1cb   :  { %373 = vperm.xlu1 %2791, %v3170_v5  }
 0x1ce   :  { %2797 = vset.pattern.permute.xlu0 %v3017_v7 }
 0x1cf   :  { %601 = vperm.xlu0 %2797, %v295_v8   ;;  %2792 = vset.pattern.permute.xlu1 %v3014_v39 }
 0x1d0   :  { %453 = vperm.xlu1 %2792, %v3170_v5  }
 0x1d3   :  { %2798 = vset.pattern.permute.xlu0 %v3015_v40 }
 0x1d4   :  { %383 = vperm.xlu0 %2798, %v2410_v9   ;;  %2793 = vset.pattern.permute.xlu1 %v3016_v6 }
 0x1d5   :  { %529 = vperm.xlu1 %2793, %v3170_v5  }
 0x1d8   :  { %2800 = vset.pattern.permute.xlu0 %v3016_v6 }
 0x1d9   :  { %537 = vperm.xlu0 %2800, %v2410_v9   ;;  %2794 = vset.pattern.permute.xlu1 %v3017_v7 }
 0x1da   :  { %605 = vperm.xlu1 %2794, %v3170_v5  }
 0x1dd   :  { %2810 = vset.pattern.permute.xlu0 %v3015_v40 }
 0x1de   :  { %2799 = vset.pattern.permute.xlu1 %v3014_v39  ;;  %388 = vperm.xlu0 %2810, %v315_v12  }
 0x1df   :  { %461 = vperm.xlu1 %2799, %v2410_v9  }
 0x1e2   :  { %2811 = vset.pattern.permute.xlu0 %v3014_v39 }
 0x1e3   :  { %2801 = vset.pattern.permute.xlu1 %v3017_v7  ;;  %465 = vperm.xlu0 %2811, %v315_v12  }
 0x1e4   :  { %613 = vperm.xlu1 %2801, %v2410_v9  }
 0x1e8   :  { %2802 = vset.pattern.permute.xlu1 %v3015_v40 }
 0x1e9   :  { %378 = vperm.xlu1 %2802, %v305_v10  }
 0x1ed   :  { %2803 = vset.pattern.permute.xlu1 %v3014_v39 }
 0x1ee   :  { %457 = vperm.xlu1 %2803, %v305_v10  }
 0x1f2   :  { %2804 = vset.pattern.permute.xlu1 %v3016_v6 }
 0x1f3   :  { %533 = vperm.xlu1 %2804, %v305_v10  }
 0x1f7   :  { %2805 = vset.pattern.permute.xlu1 %v3017_v7 }
 0x1f8   :  { %609 = vperm.xlu1 %2805, %v305_v10  }
 0x1fc   :  { %2806 = vset.pattern.permute.xlu1 %v3015_v40 }
 0x1fd   :  { %393 = vperm.xlu1 %2806, %v2413_v11  }
 0x201   :  { %2807 = vset.pattern.permute.xlu1 %v3014_v39  ;;  %324 = vxpose.xlu0.b32.start [1/8] (short) (narrow) %v285_v4, 8  ;;  %v397_v39 = vshrl.u32 %v396_v35, 7  ;;  %v3295_v35 = vld [vmem:[%s3999_s1 + $0x18] sm:$0xff] }
 0x202   :  { %469 = vperm.xlu1 %2807, %v2413_v11   ;;  %vm49_vm12 = vcmp.gt.f32.partialorder %v3295_v35, 0.0 }
 0x203   :  { %v398_v42 = vsub.s32 0, %v397_v39  ;;  %v474_v43 = vsub.s32 1, %v397_v39  ;;  %v550_v44 = vsub.s32 2, %v397_v39  ;;  %v626_v45 = vsub.s32 3, %v397_v39 }
 0x205   :  { %325 = vxpose.xlu0.b32.cont [2/8] (short) (narrow) %v3166_v3, 8 }
 0x206   :  { %2808 = vset.pattern.permute.xlu1 %v3016_v6 }
 0x207   :  { %545 = vperm.xlu1 %2808, %v2413_v11  }
 0x209   :  { %326 = vxpose.xlu0.b32.cont [3/8] (short) (narrow) %v295_v8, 8 }
 0x20b   :  { %2809 = vset.pattern.permute.xlu1 %v3017_v7 }
 0x20c   :  { %621 = vperm.xlu1 %2809, %v2413_v11  }
 0x20d   :  { %327 = vxpose.xlu0.b32.cont [4/8] (short) (narrow) %v3170_v5, 8 }
 0x210   :  { %2812 = vset.pattern.permute.xlu1 %v3016_v6 }
 0x211   :  { %541 = vperm.xlu1 %2812, %v315_v12   ;;  %328 = vxpose.xlu0.b32.cont [5/8] (short) (narrow) %v305_v10, 8 }
 0x215   :  { %2813 = vset.pattern.permute.xlu1 %v3017_v7  ;;  %329 = vxpose.xlu0.b32.cont [6/8] (short) (narrow) %v2410_v9, 8 }
 0x216   :  { %617 = vperm.xlu1 %2813, %v315_v12  }
 0x219   :  { %330 = vxpose.xlu0.b32.cont [7/8] (short) (narrow) %v315_v12, 8 }
 0x21d   :  { %331 = vxpose.xlu0.b32.end [8/8] (short) (narrow) %v2413_v11, 8 }
 0x231   :  { %v446_v13 = vpop.permute.xlu1 %445  ;;  %v364_v16 = vpop.permute.xlu0 %363 }
 0x236   :  { %v598_v14 = vpop.permute.xlu1 %597  ;;  %v522_v18 = vpop.permute.xlu0 %521 }
 0x23b   :  { %v442_v15 = vpop.permute.xlu1 %441  ;;  %v359_v20 = vpop.permute.xlu0 %358 }
 0x23f   :  { %v3214_v22 = vpop.permute.xlu0 %368 }
 0x240   :  { %v518_v17 = vpop.permute.xlu1 %517 }
 0x244   :  { %v3218_v24 = vpop.permute.xlu0 %449 }
 0x245   :  { %v3210_v19 = vpop.permute.xlu1 %593 }
 0x246   :  { %2834 = vset.pattern.permute.xlu0 %v3017_v7 }
 0x249   :  { %v3220_v26 = vpop.permute.xlu0 %525 }
 0x24a   :  { %v3212_v21 = vpop.permute.xlu1 %373 }
 0x24e   :  { %v3224_v28 = vpop.permute.xlu0 %601 }
 0x24f   :  { %v3216_v23 = vpop.permute.xlu1 %453 }
 0x253   :  { %v3228_v30 = vpop.permute.xlu0 %383 }
 0x254   :  { %v530_v25 = vpop.permute.xlu1 %529 }
 0x258   :  { %v3232_v32 = vpop.permute.xlu0 %537 }
 0x259   :  { %v3222_v27 = vpop.permute.xlu1 %605 }
 0x25d   :  { %v3236_v36 = vpop.permute.xlu0 %388 }
 0x25e   :  { %v3226_v29 = vpop.permute.xlu1 %461 }
 0x262   :  { %v3240_v40 = vpop.permute.xlu0 %465 }
 0x263   :  { %v3230_v31 = vpop.permute.xlu1 %613 }
 0x268   :  { %v3234_v34 = vpop.permute.xlu1 %378 }
 0x26d   :  { %v3238_v38 = vpop.permute.xlu1 %457 }
 0x272   :  { %v3242_v41 = vpop.permute.xlu1 %533 }
 0x277   :  { %v3260_v55 = vpop.permute.xlu1 %609 }
 0x27c   :  { %v3277_v11 = vpop.permute.xlu1 %393 }
 0x281   :  { %v340_v46 = vpop.trf.xlu0 }
 0x282   :  { %v3244_v47 = vrot.slane %v340_v46, %v398_v42  ;;  %v3246_v49 = vrot.slane %v340_v46, %v474_v43  ;;  %v3248_v50 = vrot.slane %v340_v46, %v550_v44  ;;  %v3250_v51 = vrot.slane %v340_v46, %v626_v45 }
 0x284   :  { %v477_v56 = vadd.f32 %v3246_v49, %v446_v13  ;;  %v401_v57 = vadd.f32 %v3244_v47, %v364_v16  ;;  %v553_v58 = vadd.f32 %v3248_v50, %v522_v18  ;;  %v400_v60 = vadd.f32 %v3244_v47, %v359_v20 }
 0x285   :  { %v629_v61 = vadd.f32 %v3250_v51, %v598_v14  ;;  %v476_v62 = vadd.f32 %v3246_v49, %v442_v15  ;;  %v555_v3 = vadd.f32 %v3248_v50, %v530_v25  ;;  %v552_v7 = vadd.f32 %v3248_v50, %v518_v17 }
 0x286   :  { %vm485_vm4 = vcmp.gt.f32.partialorder %v477_v56, 0.0  ;;  %v493_v63 = vmul.f32 0.2, %v477_v56  ;;  %vm409_vm5 = vcmp.gt.f32.partialorder %v401_v57, 0.0  ;;  %v417_v0 = vmul.f32 0.2, %v401_v57 }
 0x287   :  { %vm561_vm6 = vcmp.gt.f32.partialorder %v553_v58, 0.0  ;;  %v569_v1 = vmul.f32 0.2, %v553_v58  ;;  %vm408_vm7 = vcmp.gt.f32.partialorder %v400_v60, 0.0  ;;  %v416_v6 = vmul.f32 0.2, %v400_v60 }
 0x288   :  { %v501_v4 = vsel %vm485_vm4, %v477_v56, %v493_v63  ;;  %v425_v5 = vsel %vm409_vm5, %v401_v57, %v417_v0  ;;  %vm637_vm8 = vcmp.gt.f32.partialorder %v629_v61, 0.0  ;;  %v645_v17 = vmul.f32 0.2, %v629_v61  ;;  %v470_v57 = vpop.permute.xlu1 %469 }
 0x289   :  { %v3272_v8 = vsel %vm47_vm2, %v501_v4, -1e+30  ;;  %v3275_v9 = vsel %vm47_vm2, %v425_v5, -1e+30  ;;  %v577_v10 = vsel %vm561_vm6, %v553_v58, %v569_v1  ;;  %v424_v15 = vsel %vm408_vm7, %v400_v60, %v416_v6 }
 0x28a   :  { %v695_v12 = vsel %vm194_vm1, %v3272_v8, -inf  ;;  %v671_v13 = vsel %vm194_vm1, %v3275_v9, -inf  ;;  %v3284_v14 = vsel %vm47_vm2, %v577_v10, -1e+30  ;;  %v3288_v16 = vsel %vm46_vm3, %v424_v15, -1e+30 }
 0x28b   :  { %696 = vmax.xlane.f32.xlu0 %v695_v12  ;;  %672 = vmax.xlane.f32.xlu1 %v671_v13  ;;  %vm484_vm9 = vcmp.gt.f32.partialorder %v476_v62, 0.0  ;;  %v719_v18 = vsel %vm194_vm1, %v3284_v14, -inf  ;;  %v492_v20 = vmul.f32 0.2, %v476_v62  ;;  %vm563_vm10 = vcmp.gt.f32.partialorder %v555_v3, 0.0 }
 0x28c   :  { %v653_v25 = vsel %vm637_vm8, %v629_v61, %v645_v17  ;;  %v571_v39 = vmul.f32 0.2, %v555_v3  ;;  %vm560_vm11 = vcmp.gt.f32.partialorder %v552_v7, 0.0  ;;  %v568_v42 = vmul.f32 0.2, %v552_v7  ;;  %v546_v10 = vpop.permute.xlu1 %545 }
 0x28d   :  { %v668_v43 = vsel %vm194_vm1, %v3288_v16, -inf  ;;  %v3300_v44 = vsel %vm47_vm2, %v653_v25, -1e+30  ;;  %v500_v45 = vsel %vm484_vm9, %v476_v62, %v492_v20  ;;  %v631_v46 = vadd.f32 %v3250_v51, %v3222_v27 }
 0x28e   :  { %v3306_v56 = vsel %vm46_vm3, %v500_v45, -1e+30  ;;  %v579_v58 = vsel %vm563_vm10, %v555_v3, %v571_v39  ;;  %v576_v60 = vsel %vm560_vm11, %v552_v7, %v568_v42  ;;  %v743_v52 = vsel %vm194_vm1, %v3300_v44, -inf }
 0x28f   :  { %720 = vmax.xlane.f32.xlu0 %v719_v18  ;;  %669 = vmax.xlane.f32.xlu1 %v668_v43  ;;  %vm639_vm13 = vcmp.gt.f32.partialorder %v631_v46, 0.0  ;;  %v647_v61 = vmul.f32 0.2, %v631_v46  ;;  %v692_v62 = vsel %vm194_vm1, %v3306_v56, -inf  ;;  %v628_v27 = vadd.f32 %v3250_v51, %v3210_v19 }
 0x290   :  { %v557_v63 = vadd.f32 %v3248_v50, %v3232_v32  ;;  %v403_v0 = vadd.f32 %v3244_v47, %v3212_v21  ;;  %v3321_v1 = vsel %vm49_vm12, %v579_v58, -1e+30  ;;  %v3325_v3 = vsel %vm46_vm3, %v576_v60, -1e+30  ;;  %v3332_v21 = vld [vmem:[%s3999_s1 + $0x28] sm:$0xff]  ;;  %v3371_v58 = vld [vmem:[%s3999_s1 + $0x10] sm:$0xff] }
 0x291   :  { %v633_v4 = vadd.f32 %v3250_v51, %v3230_v31  ;;  %v655_v19 = vsel %vm639_vm13, %v631_v46, %v647_v61  ;;  %vm636_vm14 = vcmp.gt.f32.partialorder %v628_v27, 0.0  ;;  %v644_v5 = vmul.f32 0.2, %v628_v27 }
 0x292   :  { %v479_v32 = vadd.f32 %v3246_v49, %v3216_v23  ;;  %vm565_vm15 = vcmp.gt.f32.partialorder %v557_v63, 0.0  ;;  %v573_v6 = vmul.f32 0.2, %v557_v63  ;;  %vm411_vm2 = vcmp.gt.f32.partialorder %v403_v0, 0.0 }
 0x293   :  { %744 = vmax.xlane.f32.xlu0 %v743_v52  ;;  %693 = vmax.xlane.f32.xlu1 %v692_v62  ;;  %v419_v7 = vmul.f32 0.2, %v403_v0  ;;  %v725_v12 = vsel %vm194_vm1, %v3321_v1, -inf  ;;  %v716_v31 = vsel %vm194_vm1, %v3325_v3, -inf  ;;  %v652_v13 = vsel %vm636_vm14, %v628_v27, %v644_v5  ;;  %v622_v52 = vpop.permute.xlu1 %621 }
 0x294   :  { %v3342_v15 = vsel %vm49_vm12, %v655_v19, -1e+30  ;;  %v3346_v23 = vsel %vm46_vm3, %v652_v13, -1e+30  ;;  %vm51_vm4 = vcmp.gt.f32.partialorder %v3332_v21, 0.0  ;;  %v581_v17 = vsel %vm565_vm15, %v557_v63, %v573_v6 }
 0x295   :  { %v427_v18 = vsel %vm411_vm2, %v403_v0, %v419_v7  ;;  %v649_v20 = vmul.f32 0.2, %v633_v4  ;;  %v483_v25 = vadd.f32 %v3246_v49, %v470_v57  ;;  %vm641_vm5 = vcmp.gt.f32.partialorder %v633_v4, 0.0 }
 0x296   :  { %vm487_vm6 = vcmp.gt.f32.partialorder %v479_v32, 0.0  ;;  %v749_v39 = vsel %vm194_vm1, %v3342_v15, -inf  ;;  %v740_v42 = vsel %vm194_vm1, %v3346_v23, -inf  ;;  %v495_v43 = vmul.f32 0.2, %v479_v32 }
 0x297   :  { %726 = vmax.xlane.f32.xlu0 %v725_v12  ;;  %717 = vmax.xlane.f32.xlu1 %v716_v31  ;;  %v559_v45 = vadd.f32 %v3248_v50, %v546_v10  ;;  %v3362_v46 = vsel %vm51_vm4, %v581_v17, -1e+30  ;;  %v3366_v57 = vsel %vm49_vm12, %v427_v18, -1e+30  ;;  %v402_v60 = vadd.f32 %v3244_v47, %v3214_v22 }
 0x298   :  { %v657_v61 = vsel %vm641_vm5, %v633_v4, %v649_v20  ;;  %v503_v62 = vsel %vm487_vm6, %v479_v32, %v495_v43  ;;  %v499_v27 = vmul.f32 0.2, %v483_v25  ;;  %v478_v63 = vadd.f32 %v3246_v49, %v3218_v24 }
 0x299   :  { %vm53_vm3 = vcmp.gt.f32.partialorder %v3357_v53, 0.0  ;;  %vm491_vm7 = vcmp.gt.f32.partialorder %v483_v25, 0.0  ;;  %vm410_vm8 = vcmp.gt.f32.partialorder %v402_v60, 0.0  ;;  %v731_v0 = vsel %vm194_vm1, %v3362_v46, -inf }
 0x29a   :  { %v677_v19 = vsel %vm194_vm1, %v3366_v57, -inf  ;;  %vm48_vm9 = vcmp.gt.f32.partialorder %v3371_v58, 0.0  ;;  %v418_v22 = vmul.f32 0.2, %v402_v60  ;;  %v575_v5 = vmul.f32 0.2, %v559_v45 }
 0x29b   :  { %750 = vmax.xlane.f32.xlu0 %v749_v39  ;;  %741 = vmax.xlane.f32.xlu1 %v740_v42  ;;  %v635_v4 = vadd.f32 %v3250_v51, %v622_v52  ;;  %v3386_v24 = vsel %vm51_vm4, %v657_v61, -1e+30  ;;  %v3390_v32 = vsel %vm49_vm12, %v503_v62, -1e+30  ;;  %v507_v6 = vsel %vm491_vm7, %v483_v25, %v499_v27 }
 0x29c   :  { %v426_v7 = vsel %vm410_vm8, %v402_v60, %v418_v22  ;;  %v494_v10 = vmul.f32 0.2, %v478_v63  ;;  %v554_v12 = vadd.f32 %v3248_v50, %v3220_v26  ;;  %vm567_vm10 = vcmp.gt.f32.partialorder %v559_v45, 0.0 }
 0x29d   :  { %vm486_vm11 = vcmp.gt.f32.partialorder %v478_v63, 0.0  ;;  %v755_v31 = vsel %vm194_vm1, %v3386_v24, -inf  ;;  %v701_v13 = vsel %vm194_vm1, %v3390_v32, -inf  ;;  %v651_v17 = vmul.f32 0.2, %v635_v4 }
 0x29e   :  { %v3400_v35 = vsel %vm53_vm3, %v507_v6, -1e+30  ;;  %v3404_v18 = vsel %vm48_vm9, %v426_v7, -1e+30  ;;  %v583_v26 = vsel %vm567_vm10, %v559_v45, %v575_v5  ;;  %v502_v20 = vsel %vm486_vm11, %v478_v63, %v494_v10 }
 0x29f   :  { %732 = vmax.xlane.f32.xlu0 %v731_v0  ;;  %678 = vmax.xlane.f32.xlu1 %v677_v19  ;;  %v570_v25 = vmul.f32 0.2, %v554_v12  ;;  %v630_v39 = vadd.f32 %v3250_v51, %v3224_v28  ;;  %vm643_vm12 = vcmp.gt.f32.partialorder %v635_v4, 0.0  ;;  %vm562_vm13 = vcmp.gt.f32.partialorder %v554_v12, 0.0 }
 0x2a0   :  { %v713_v42 = vsel %vm194_vm1, %v3400_v35, -inf  ;;  %v674_v43 = vsel %vm194_vm1, %v3404_v18, -inf  ;;  %v3414_v60 = vsel %vm53_vm3, %v583_v26, -1e+30  ;;  %v3418_v45 = vsel %vm48_vm9, %v502_v20, -1e+30 }
 0x2a1   :  { %v659_v52 = vsel %vm643_vm12, %v635_v4, %v651_v17  ;;  %v578_v28 = vsel %vm562_vm13, %v554_v12, %v570_v25  ;;  %v646_v61 = vmul.f32 0.2, %v630_v39  ;;  %v405_v62 = vadd.f32 %v3244_v47, %v3228_v30  ;;  %v42_v20 = vld [vmem:[%s3999_s1 + $0x20] sm:$0xff] }
 0x2a2   :  { %vm638_vm14 = vcmp.gt.f32.partialorder %v630_v39, 0.0  ;;  %v737_v27 = vsel %vm194_vm1, %v3414_v60, -inf  ;;  %v698_v63 = vsel %vm194_vm1, %v3418_v45, -inf  ;;  %v3428_v0 = vsel %vm53_vm3, %v659_v52, -1e+30 }
 0x2a3   :  { %756 = vmax.xlane.f32.xlu0 %v755_v31  ;;  %702 = vmax.xlane.f32.xlu1 %v701_v13  ;;  %v3432_v19 = vsel %vm48_vm9, %v578_v28, -1e+30  ;;  %v654_v22 = vsel %vm638_vm14, %v630_v39, %v646_v61  ;;  %v421_v5 = vmul.f32 0.2, %v405_v62  ;;  %v481_v30 = vadd.f32 %v3246_v49, %v3226_v29 }
 0x2a4   :  { %vm413_vm15 = vcmp.gt.f32.partialorder %v405_v62, 0.0  ;;  %v3438_v4 = vadd.f32 %v3246_v49, %v3240_v40  ;;  %v761_v6 = vsel %vm194_vm1, %v3428_v0, -inf  ;;  %v722_v7 = vsel %vm194_vm1, %v3432_v19, -inf }
 0x2a5   :  { %v3446_v10 = vsel %vm48_vm9, %v654_v22, -1e+30  ;;  %v429_v12 = vsel %vm413_vm15, %v405_v62, %v421_v5  ;;  %v497_v31 = vmul.f32 0.2, %v481_v30  ;;  %v404_v29 = vadd.f32 %v3244_v47, %v3234_v34 }
 0x2a6   :  { %vm489_vm2 = vcmp.gt.f32.partialorder %v481_v30, 0.0  ;;  %v746_v40 = vsel %vm194_vm1, %v3446_v10, -inf  ;;  %v3454_v13 = vsel %vm51_vm4, %v429_v12, -1e+30  ;;  %v480_v58 = vadd.f32 %v3246_v49, %v3238_v38  ;;  %v542_v12 = vpop.permute.xlu1 %541 }
 0x2a7   :  { %714 = vmax.xlane.f32.xlu0 %v713_v42  ;;  %675 = vmax.xlane.f32.xlu1 %v674_v43  ;;  %v505_v17 = vsel %vm489_vm2, %v481_v30, %v497_v31  ;;  %v420_v26 = vmul.f32 0.2, %v404_v29  ;;  %vm412_vm5 = vcmp.gt.f32.partialorder %v404_v29, 0.0  ;;  %v683_v34 = vsel %vm194_vm1, %v3454_v13, -inf }
 0x2a8   :  { %v3465_v25 = vsel %vm51_vm4, %v505_v17, -1e+30  ;;  %vm50_vm6 = vcmp.gt.f32.partialorder %v42_v20, 0.0  ;;  %v496_v42 = vmul.f32 0.2, %v480_v58  ;;  %v556_v43 = vadd.f32 %v3248_v50, %v3242_v41 }
 0x2a9   :  { %v428_v39 = vsel %vm412_vm5, %v404_v29, %v420_v26  ;;  %vm488_vm7 = vcmp.gt.f32.partialorder %v480_v58, 0.0  ;;  %v707_v38 = vsel %vm194_vm1, %v3465_v25, -inf  ;;  %v632_v21 = vadd.f32 %v3250_v51, %v3260_v55 }
 0x2aa   :  { %v3472_v49 = vsel %vm50_vm6, %v428_v39, -1e+30  ;;  %v504_v52 = vsel %vm488_vm7, %v480_v58, %v496_v42  ;;  %v572_v28 = vmul.f32 0.2, %v556_v43  ;;  %vm564_vm4 = vcmp.gt.f32.partialorder %v556_v43, 0.0  ;;  %v618_v20 = vpop.permute.xlu1 %617 }
 0x2ab   :  { %738 = vmax.xlane.f32.xlu0 %v737_v27  ;;  %699 = vmax.xlane.f32.xlu1 %v698_v63  ;;  %v680_v61 = vsel %vm194_vm1, %v3472_v49, -inf  ;;  %v3479_v41 = vsel %vm50_vm6, %v504_v52, -1e+30  ;;  %v648_v27 = vmul.f32 0.2, %v632_v21  ;;  %v407_v63 = vadd.f32 %v3244_v47, %v3277_v11 }
 0x2ac   :  { %v580_v62 = vsel %vm564_vm4, %v556_v43, %v572_v28  ;;  %vm640_vm8 = vcmp.gt.f32.partialorder %v632_v21, 0.0  ;;  %v704_v22 = vsel %vm194_vm1, %v3479_v41, -inf  ;;  %v498_v58 = vmul.f32 0.2, %v3438_v4 }
 0x2ad   :  { %v3486_v55 = vsel %vm50_vm6, %v580_v62, -1e+30  ;;  %v656_v5 = vsel %vm640_vm8, %v632_v21, %v648_v27  ;;  %v423_v30 = vmul.f32 0.2, %v407_v63  ;;  %vm415_vm9 = vcmp.gt.f32.partialorder %v407_v63, 0.0 }
 0x2ae   :  { %v3493_v11 = vsel %vm50_vm6, %v656_v5, -1e+30  ;;  %vm490_vm12 = vcmp.gt.f32.partialorder %v3438_v4, 0.0  ;;  %v634_v53 = vadd.f32 %v3250_v51, %v618_v20  ;;  %vm1712_vm14 = vcmask 261120  }
 0x2af   :  { %762 = vmax.xlane.f32.xlu0 %v761_v6  ;;  %723 = vmax.xlane.f32.xlu1 %v722_v7  ;;  %v406_v6 = vadd.f32 %v3244_v47, %v3236_v36  ;;  %v728_v7 = vsel %vm194_vm1, %v3486_v55, -inf  ;;  %v431_v31 = vsel %vm415_vm9, %v407_v63, %v423_v30  ;;  %v752_v17 = vsel %vm194_vm1, %v3493_v11, -inf }
 0x2b0   :  { %v3502_v36 = vsel %vm53_vm3, %v431_v31, -1e+30  ;;  %v558_v47 = vadd.f32 %v3248_v50, %v542_v12  ;;  %v506_v43 = vsel %vm490_vm12, %v3438_v4, %v498_v58  ;;  %v650_v52 = vmul.f32 0.2, %v634_v53 }
 0x2b1   :  { %v422_v29 = vmul.f32 0.2, %v406_v6  ;;  %vm414_vm10 = vcmp.gt.f32.partialorder %v406_v6, 0.0  ;;  %vm642_vm13 = vcmp.gt.f32.partialorder %v634_v53, 0.0  ;;  %vm1721_vm15 = vcmask 392192  }
 0x2b2   :  { %v574_v42 = vmul.f32 0.2, %v558_v47  ;;  %vm566_vm3 = vcmp.gt.f32.partialorder %v558_v47, 0.0  ;;  %v658_v51 = vsel %vm642_vm13, %v634_v53, %v650_v52  ;;  %vm2156_vm2 = vcmask 254976  }
 0x2b3   :  { %747 = vmax.xlane.f32.xlu1 %v746_v40  ;;  %v44_v40 = vld [vmem:[%s3999_s1 + $0x30] sm:$0xff]  ;;  %v430_v26 = vsel %vm414_vm10, %v406_v6, %v422_v29 }
 0x2b4   :  { %vm52_vm11 = vcmp.gt.f32.partialorder %v44_v40, 0.0  ;;  %v582_v28 = vsel %vm566_vm3, %v558_v47, %v574_v42 }
 0x2b5   :  { %v3510_v39 = vsel %vm52_vm11, %v430_v26, -1e+30  ;;  %v3527_v62 = vsel %vm52_vm11, %v658_v51, -1e+30 }
 0x2b6   :  { %v686_v50 = vsel %vm194_vm1, %v3510_v39, -inf  ;;  %v758_v27 = vsel %vm194_vm1, %v3527_v62, -inf }
 0x2b7   :  { %684 = vmax.xlane.f32.xlu1 %v683_v34  ;;  %v689_v34 = vsel %vm194_vm1, %v3502_v36, -inf }
 0x2bb   :  { %708 = vmax.xlane.f32.xlu1 %v707_v38  ;;  %v3517_v38 = vsel %vm52_vm11, %v506_v43, -1e+30 }
 0x2bc   :  { %v710_v21 = vsel %vm194_vm1, %v3517_v38, -inf }
 0x2bf   :  { %681 = vmax.xlane.f32.xlu1 %v680_v61  ;;  %v3522_v61 = vsel %vm52_vm11, %v582_v28, -1e+30 }
 0x2c0   :  { %v734_v4 = vsel %vm194_vm1, %v3522_v61, -inf }
 0x2c3   :  { %705 = vmax.xlane.f32.xlu1 %v704_v22 }
 0x2c7   :  { %729 = vmax.xlane.f32.xlu1 %v728_v7 }
 0x2cb   :  { %753 = vmax.xlane.f32.xlu1 %v752_v17 }
 0x2cf   :  { %690 = vmax.xlane.f32.xlu1 %v689_v34 }
 0x2d3   :  { %687 = vmax.xlane.f32.xlu1 %v686_v50 }
 0x2d7   :  { %711 = vmax.xlane.f32.xlu1 %v710_v21 }
 0x2db   :  { %735 = vmax.xlane.f32.xlu1 %v734_v4 }
 0x2df   :  { %759 = vmax.xlane.f32.xlu1 %v758_v27 }
 0x318   :  { %v697_v63 = vpop.xlane.xlu0 %696  ;;  %v673_v22 = vpop.xlane.xlu1 %672 }
 0x319   :  { %v773_v5 = vsub.f32 %v3272_v8, %v697_v63  ;;  %v765_v30 = vsub.f32 %v3275_v9, %v673_v22 }
 0x31b   :  { %v798_v6 = vmul.f32 1.442695, %v765_v30  ;;  %v814_v7 = vmul.f32 1.442695, %v773_v5 }
 0x31c   :  { %v721_v12 = vpop.xlane.xlu0 %720  ;;  %v670_v31 = vpop.xlane.xlu1 %669 }
 0x31d   :  { %v781_v29 = vsub.f32 %v3284_v14, %v721_v12  ;;  %v764_v40 = vsub.f32 %v3288_v16, %v670_v31  ;;  %2835 = vpow2.f32 %v798_v6 }
 0x31e   :  { %2837 = vpow2.f32 %v814_v7 }
 0x31f   :  { %v830_v17 = vmul.f32 1.442695, %v781_v29  ;;  %v796_v47 = vmul.f32 1.442695, %v764_v40 }
 0x320   :  { %v745_v26 = vpop.xlane.xlu0 %744  ;;  %v694_v58 = vpop.xlane.xlu1 %693 }
 0x321   :  { %2839 = vpow2.f32 %v830_v17  ;;  %v789_v20 = vsub.f32 %v3300_v44, %v745_v26  ;;  %v772_v8 = vsub.f32 %v3306_v56, %v694_v58 }
 0x322   :  { %2841 = vpow2.f32 %v796_v47 }
 0x323   :  { %v846_v9 = vmul.f32 1.442695, %v789_v20  ;;  %v812_v34 = vmul.f32 1.442695, %v772_v8 }
 0x324   :  { %v727_v42 = vpop.xlane.xlu0 %726  ;;  %v718_v53 = vpop.xlane.xlu1 %717 }
 0x325   :  { %2843 = vpow2.f32 %v846_v9  ;;  %v783_v14 = vsub.f32 %v3321_v1, %v727_v42  ;;  %v780_v16 = vsub.f32 %v3325_v3, %v718_v53 }
 0x326   :  { %2845 = vpow2.f32 %v812_v34 }
 0x327   :  { %v834_v43 = vmul.f32 1.442695, %v783_v14  ;;  %v828_v50 = vmul.f32 1.442695, %v780_v16  ;;  %v3539_v52 = vpop.eup %2835 }
 0x328   :  { %v751_v28 = vpop.xlane.xlu0 %750  ;;  %v742_v21 = vpop.xlane.xlu1 %741  ;;  %v863_v51 = vsel %vm194_vm1, %v3539_v52, 0.0 }
 0x329   :  { %v791_v44 = vsub.f32 %v3342_v15, %v751_v28  ;;  %v788_v56 = vsub.f32 %v3346_v23, %v742_v21  ;;  %v3545_v4 = vpop.eup %2837  ;;  %2847 = vpow2.f32 %v828_v50  ;;  %864 = vadd.xlane.f32.xlu0 %v863_v51 }
 0x32a   :  { %2849 = vpow2.f32 %v834_v43  ;;  %v887_v23 = vsel %vm194_vm1, %v3545_v4, 0.0 }
 0x32b   :  { %v3547_v1 = vpop.eup %2839  ;;  %v850_v3 = vmul.f32 1.442695, %v791_v44  ;;  %v844_v27 = vmul.f32 1.442695, %v788_v56 }
 0x32c   :  { %v679_v63 = vpop.xlane.xlu1 %678  ;;  %v911_v22 = vsel %vm194_vm1, %v3547_v1, 0.0  ;;  %v3551_v5 = vpop.eup %2841 }
 0x32d   :  { %v767_v15 = vsub.f32 %v3366_v57, %v679_v63  ;;  %912 = vadd.xlane.f32.xlu1 %v911_v22  ;;  %2851 = vpow2.f32 %v844_v27  ;;  %888 = vadd.xlane.f32.xlu0 %v887_v23  ;;  %v860_v31 = vsel %vm194_vm1, %v3551_v5, 0.0  ;;  %v733_v34 = vpop.xlane.xlu0 %732 }
 0x32e   :  { %2853 = vpow2.f32 %v850_v3  ;;  %v785_v51 = vsub.f32 %v3362_v46, %v733_v34 }
 0x32f   :  { %v3556_v30 = vpop.eup %2843  ;;  %v802_v6 = vmul.f32 1.442695, %v767_v15 }
 0x330   :  { %v703_v7 = vpop.xlane.xlu1 %702  ;;  %v935_v12 = vsel %vm194_vm1, %v3556_v30, 0.0  ;;  %v3562_v29 = vpop.eup %2845 }
 0x331   :  { %v775_v57 = vsub.f32 %v3390_v32, %v703_v7  ;;  %861 = vadd.xlane.f32.xlu1 %v860_v31  ;;  %2855 = vpow2.f32 %v802_v6  ;;  %936 = vadd.xlane.f32.xlu0 %v935_v12  ;;  %v884_v26 = vsel %vm194_vm1, %v3562_v29, 0.0 }
 0x333   :  { %v818_v40 = vmul.f32 1.442695, %v775_v57  ;;  %v3565_v17 = vpop.eup %2847 }
 0x334   :  { %v676_v47 = vpop.xlane.xlu1 %675  ;;  %v3569_v58 = vpop.eup %2849  ;;  %v908_v8 = vsel %vm194_vm1, %v3565_v17, 0.0 }
 0x335   :  { %v766_v20 = vsub.f32 %v3404_v18, %v676_v47  ;;  %885 = vadd.xlane.f32.xlu1 %v884_v26  ;;  %2857 = vpow2.f32 %v818_v40  ;;  %909 = vadd.xlane.f32.xlu0 %v908_v8  ;;  %v917_v53 = vsel %vm194_vm1, %v3569_v58, 0.0 }
 0x337   :  { %v800_v32 = vmul.f32 1.442695, %v766_v20  ;;  %v3574_v9 = vpop.eup %2851 }
 0x338   :  { %v700_v42 = vpop.xlane.xlu1 %699  ;;  %v3578_v14 = vpop.eup %2853  ;;  %v932_v18 = vsel %vm194_vm1, %v3574_v9, 0.0 }
 0x339   :  { %v774_v16 = vsub.f32 %v3418_v45, %v700_v42  ;;  %918 = vadd.xlane.f32.xlu1 %v917_v53  ;;  %2859 = vpow2.f32 %v800_v32  ;;  %933 = vadd.xlane.f32.xlu0 %v932_v18  ;;  %v941_v21 = vsel %vm194_vm1, %v3578_v14, 0.0  ;;  %v757_v45 = vpop.xlane.xlu0 %756 }
 0x33b   :  { %v816_v43 = vmul.f32 1.442695, %v774_v16  ;;  %v3583_v50 = vpop.eup %2855 }
 0x33c   :  { %v724_v28 = vpop.xlane.xlu1 %723  ;;  %v869_v56 = vsel %vm194_vm1, %v3583_v50, 0.0 }
 0x33d   :  { %v782_v44 = vsub.f32 %v3432_v19, %v724_v28  ;;  %942 = vadd.xlane.f32.xlu1 %v941_v21  ;;  %2861 = vpow2.f32 %v816_v43  ;;  %870 = vadd.xlane.f32.xlu0 %v869_v56  ;;  %v838_v19 = vmul.f32 1.442695, %v785_v51  ;;  %v3598_v7 = vpop.xlane.xlu0 %714 }
 0x33f   :  { %v832_v3 = vmul.f32 1.442695, %v782_v44  ;;  %v3591_v27 = vpop.eup %2857 }
 0x340   :  { %v748_v63 = vpop.xlane.xlu1 %747  ;;  %v893_v15 = vsel %vm194_vm1, %v3591_v27, 0.0 }
 0x341   :  { %v790_v22 = vsub.f32 %v3446_v10, %v748_v63  ;;  %2863 = vpow2.f32 %v832_v3  ;;  %894 = vadd.xlane.f32.xlu0 %v893_v15  ;;  %v793_v10 = vsub.f32 %v3386_v24, %v757_v45  ;;  %v739_v8 = vpop.xlane.xlu0 %738 }
 0x343   :  { %v848_v23 = vmul.f32 1.442695, %v790_v22  ;;  %v3596_v6 = vpop.eup %2859 }
 0x344   :  { %v685_v12 = vpop.xlane.xlu1 %684  ;;  %v866_v31 = vsel %vm194_vm1, %v3596_v6, 0.0 }
 0x345   :  { %2865 = vpow2.f32 %v848_v23  ;;  %v769_v46 = vsub.f32 %v3454_v13, %v685_v12  ;;  %867 = vadd.xlane.f32.xlu1 %v866_v31  ;;  %v854_v13 = vmul.f32 1.442695, %v793_v10  ;;  %v763_v43 = vpop.xlane.xlu0 %762 }
 0x346   :  { %2867 = vpow2.f32 %v838_v19  ;;  %v795_v51 = vsub.f32 %v3428_v0, %v763_v43 }
 0x347   :  { %v806_v57 = vmul.f32 1.442695, %v769_v46  ;;  %v3604_v40 = vpop.eup %2861 }
 0x348   :  { %v709_v47 = vpop.xlane.xlu1 %708  ;;  %v890_v20 = vsel %vm194_vm1, %v3604_v40, 0.0  ;;  %v858_v19 = vmul.f32 1.442695, %v795_v51 }
 0x349   :  { %2869 = vpow2.f32 %v806_v57  ;;  %v777_v26 = vsub.f32 %v3465_v25, %v709_v47  ;;  %891 = vadd.xlane.f32.xlu1 %v890_v20  ;;  %v787_v25 = vsub.f32 %v3414_v60, %v739_v8 }
 0x34b   :  { %v822_v32 = vmul.f32 1.442695, %v777_v26  ;;  %v3609_v34 = vpop.eup %2863  ;;  %v842_v45 = vmul.f32 1.442695, %v787_v25 }
 0x34c   :  { %v682_v42 = vpop.xlane.xlu1 %681  ;;  %v914_v53 = vsel %vm194_vm1, %v3609_v34, 0.0 }
 0x34d   :  { %2871 = vpow2.f32 %v822_v32  ;;  %v768_v24 = vsub.f32 %v3472_v49, %v682_v42  ;;  %915 = vadd.xlane.f32.xlu0 %v914_v53 }
 0x34e   :  { %2873 = vpow2.f32 %v854_v13 }
 0x34f   :  { %v3614_v16 = vpop.eup %2865  ;;  %v804_v18 = vmul.f32 1.442695, %v768_v24 }
 0x350   :  { %v706_v28 = vpop.xlane.xlu1 %705  ;;  %v938_v21 = vsel %vm194_vm1, %v3614_v16, 0.0  ;;  %v3619_v44 = vpop.eup %2867 }
 0x351   :  { %2875 = vpow2.f32 %v804_v18  ;;  %v776_v49 = vsub.f32 %v3479_v41, %v706_v28  ;;  %939 = vadd.xlane.f32.xlu1 %v938_v21  ;;  %v923_v60 = vsel %vm194_vm1, %v3619_v44, 0.0 }
 0x353   :  { %v3622_v56 = vpop.eup %2869  ;;  %v820_v3 = vmul.f32 1.442695, %v776_v49 }
 0x354   :  { %v730_v63 = vpop.xlane.xlu1 %729  ;;  %v875_v22 = vsel %vm194_vm1, %v3622_v56, 0.0 }
 0x355   :  { %2877 = vpow2.f32 %v820_v3  ;;  %v784_v15 = vsub.f32 %v3486_v55, %v730_v63  ;;  %924 = vadd.xlane.f32.xlu1 %v923_v60  ;;  %876 = vadd.xlane.f32.xlu0 %v875_v22  ;;  %v779_v55 = vsub.f32 %v3400_v35, %v3598_v7 }
 0x356   :  { %2879 = vpow2.f32 %v842_v45 }
 0x357   :  { %v3630_v41 = vpop.eup %2871  ;;  %v836_v23 = vmul.f32 1.442695, %v784_v15  ;;  %v826_v13 = vmul.f32 1.442695, %v779_v55 }
 0x358   :  { %v754_v12 = vpop.xlane.xlu1 %753  ;;  %v899_v0 = vsel %vm194_vm1, %v3630_v41, 0.0  ;;  %v3634_v46 = vpop.eup %2873 }
 0x359   :  { %2881 = vpow2.f32 %v836_v23  ;;  %v792_v31 = vsub.f32 %v3493_v11, %v754_v12  ;;  %900 = vadd.xlane.f32.xlu0 %v899_v0  ;;  %v947_v26 = vsel %vm194_vm1, %v3634_v46, 0.0 }
 0x35a   :  { %2883 = vpow2.f32 %v858_v19 }
 0x35b   :  { %v3637_v10 = vpop.eup %2875  ;;  %v852_v57 = vmul.f32 1.442695, %v792_v31 }
 0x35c   :  { %v691_v47 = vpop.xlane.xlu1 %690  ;;  %v872_v20 = vsel %vm194_vm1, %v3637_v10, 0.0 }
 0x35d   :  { %2885 = vpow2.f32 %v852_v57  ;;  %v771_v8 = vsub.f32 %v3502_v36, %v691_v47  ;;  %948 = vadd.xlane.f32.xlu0 %v947_v26  ;;  %873 = vadd.xlane.f32.xlu1 %v872_v20 }
 0x35f   :  { %v3646_v11 = vpop.eup %2877  ;;  %v810_v32 = vmul.f32 1.442695, %v771_v8 }
 0x360   :  { %v688_v42 = vpop.xlane.xlu1 %687  ;;  %v896_v35 = vsel %vm194_vm1, %v3646_v11, 0.0  ;;  %v3650_v7 = vpop.eup %2879 }
 0x361   :  { %2887 = vpow2.f32 %v810_v32  ;;  %v770_v24 = vsub.f32 %v3510_v39, %v688_v42  ;;  %897 = vadd.xlane.f32.xlu1 %v896_v35  ;;  %v929_v18 = vsel %vm194_vm1, %v3650_v7, 0.0 }
 0x362   :  { %2889 = vpow2.f32 %v826_v13 }
 0x363   :  { %v3653_v53 = vpop.eup %2881  ;;  %v808_v36 = vmul.f32 1.442695, %v770_v24 }
 0x364   :  { %v712_v25 = vpop.xlane.xlu1 %711  ;;  %v920_v43 = vsel %vm194_vm1, %v3653_v53, 0.0  ;;  %v3659_v28 = vpop.eup %2883 }
 0x365   :  { %v778_v21 = vsub.f32 %v3517_v38, %v712_v25  ;;  %930 = vadd.xlane.f32.xlu1 %v929_v18  ;;  %921 = vadd.xlane.f32.xlu0 %v920_v43  ;;  %2891 = vpow2.f32 %v808_v36  ;;  %v953_v51 = vsel %vm194_vm1, %v3659_v28, 0.0  ;;  %v2766_v43 = vunpack.i.l.bf16 %v3159_v54 }
 0x367   :  { %v3662_v49 = vpop.eup %2885  ;;  %v824_v39 = vmul.f32 1.442695, %v778_v21 }
 0x368   :  { %v736_v45 = vpop.xlane.xlu1 %735  ;;  %v944_v3 = vsel %vm194_vm1, %v3662_v49, 0.0 }
 0x369   :  { %v786_v63 = vsub.f32 %v3522_v61, %v736_v45  ;;  %954 = vadd.xlane.f32.xlu1 %v953_v51  ;;  %945 = vadd.xlane.f32.xlu0 %v944_v3  ;;  %2893 = vpow2.f32 %v824_v39 }
 0x36b   :  { %v3669_v60 = vpop.eup %2887  ;;  %v840_v38 = vmul.f32 1.442695, %v786_v63  ;;  %v2772_v63 = vunpack.i.h.bf16 %v3161_v59 }
 0x36c   :  { %v881_v22 = vsel %vm194_vm1, %v3669_v60, 0.0  ;;  %v3673_v15 = vpop.eup %2889  ;;  %v760_v57 = vpop.xlane.xlu1 %759 }
 0x36d   :  { %882 = vadd.xlane.f32.xlu0 %v881_v22  ;;  %2895 = vpow2.f32 %v840_v38  ;;  %v905_v19 = vsel %vm194_vm1, %v3673_v15, 0.0  ;;  %v794_v47 = vsub.f32 %v3527_v62, %v760_v57  ;;  %v2771_v38 = vunpack.i.l.bf16 %v3161_v59 }
 0x36f   :  { %v3677_v23 = vpop.eup %2891  ;;  %v856_v26 = vmul.f32 1.442695, %v794_v47 }
 0x370   :  { %v878_v61 = vsel %vm194_vm1, %v3677_v23, 0.0 }
 0x371   :  { %906 = vadd.xlane.f32.xlu0 %v905_v19  ;;  %2897 = vpow2.f32 %v856_v26 }
 0x373   :  { %v3681_v12 = vpop.eup %2893 }
 0x374   :  { %v902_v0 = vsel %vm194_vm1, %v3681_v12, 0.0 }
 0x375   :  { %879 = vadd.xlane.f32.xlu0 %v878_v61 }
 0x377   :  { %v3685_v31 = vpop.eup %2895 }
 0x378   :  { %v926_v55 = vsel %vm194_vm1, %v3685_v31, 0.0 }
 0x379   :  { %903 = vadd.xlane.f32.xlu0 %v902_v0 }
 0x37a   :  { %2820 = vrot.lane.b32.xlu1 %v3140_v33, %s3013_s0 }
 0x37b   :  { %v3696_v20 = vpop.eup %2897 }
 0x37c   :  { %v950_v8 = vsel %vm194_vm1, %v3696_v20, 0.0 }
 0x37d   :  { %927 = vadd.xlane.f32.xlu0 %v926_v55 }
 0x37e   :  { %2825 = vrot.lane.b32.xlu1 %v3147_v37, %s3011_s16 }
 0x393   :  { %2815 = vrot.lane.b32.xlu0 %v3140_v33, %s3011_s16 }
 0x3a2   :  { %951 = vadd.xlane.f32.xlu1 %v950_v8 }
 0x3b3   :  { %2830 = vrot.lane.b32.xlu1 %v3147_v37, %s3013_s0  ;;  %v2767_v37 = vunpack.i.h.bf16 %v3159_v54 }
 0x3b5   :  { %v2657_v22 = vpack.c.bf16 %v2767_v37, %v2766_v43 }
 0x3b6   :  { %v865_v13 = vpop.xlane.xlu0 %864 }
 0x3b7   :  { %2899 = vrcp.f32 %v865_v13 }
 0x3ba   :  { %v3702_v32 = vpop.xlane.xlu1 %912  ;;  %v889_v42 = vpop.xlane.xlu0 %888 }
 0x3be   :  { %v862_v62 = vpop.xlane.xlu1 %861  ;;  %v3704_v35 = vpop.xlane.xlu0 %936 }
 0x3bf   :  { %2901 = vrcp.f32 %v862_v62 }
 0x3c0   :  { %2903 = vrcp.f32 %v889_v42 }
 0x3c1   :  { %v2900_v36 = vpop.eup %2899 }
 0x3c2   :  { %v886_v33 = vpop.xlane.xlu1 %885  ;;  %v3706_v24 = vpop.xlane.xlu0 %909  ;;  %v989_v45 = vmul.f32 %v2900_v36, %v3539_v52  ;;  %v2673_v52 = vpack.c.bf16 %v2772_v63, %v2771_v38 }
 0x3c3   :  { %2905 = vrcp.f32 %v886_v33 }
 0x3c6   :  { %v3708_v25 = vpop.xlane.xlu0 %933  ;;  %v3712_v21 = vpop.xlane.xlu1 %918 }
 0x3c9   :  { %v2902_v18 = vpop.eup %2901 }
 0x3ca   :  { %v988_v39 = vmul.f32 %v2902_v18, %v3551_v5  ;;  %v2904_v51 = vpop.eup %2903  ;;  %v871_v19 = vpop.xlane.xlu0 %870 }
 0x3cb   :  { %v997_v5 = vmul.f32 %v2904_v51, %v3545_v4  ;;  %v3723_v61 = vpop.xlane.xlu1 %942  ;;  %2907 = vrcp.f32 %v871_v19 }
 0x3cc   :  { %2430 = vmatprep.mubr.msk.f32.mxu0 %vm194_vm1, %v988_v39 }
 0x3cd   :  { %v2906_v3 = vpop.eup %2905  ;;  %2431 = vmatmul.mubr.msk.f32.vlgmr.msra.gmra.mrb[8].mxu0 %vm194_vm1, %v989_v45 }
 0x3ce   :  { %2656 = vmatpush3.bf16.msra.mxu0 %v3156_v48  ;;  %v996_v54 = vmul.f32 %v2906_v3, %v3562_v29  ;;  %v895_v0 = vpop.xlane.xlu0 %894 }
 0x3cf   :  { %2658 = vmatprep.subr.bf16.mxu0 %v2657_v22 }
 0x3d0   :  { %2458 = vmatprep.mubr.msk.f32.mxu1 %vm194_vm1, %v996_v54 }
 0x3d1   :  { %2459 = vmatmul.mubr.msk.f32.vlgmr.msra.gmra.mrb[8].mxu1 %vm194_vm1, %v997_v5 }
 0x3d2   :  { %2660 = vmatpush3.bf16.msra.mxu0 %v2657_v22  ;;  %2672 = vmatpush3.bf16.msra.mxu1 %v3163_v2  ;;  %v868_v59 = vpop.xlane.xlu1 %867 }
 0x3d3   :  { %2674 = vmatprep.subr.bf16.mxu1 %v2673_v52  ;;  %2909 = vrcp.f32 %v868_v59 }
 0x3d4   :  { %2911 = vrcp.f32 %v895_v0 }
 0x3d5   :  { %v2908_v4 = vpop.eup %2907 }
 0x3d6   :  { %2676 = vmatpush3.bf16.msra.mxu1 %v2673_v52  ;;  %v892_v48 = vpop.xlane.xlu1 %891  ;;  %v991_v26 = vmul.f32 %v2908_v4, %v3583_v50 }
 0x3d7   :  { %2913 = vrcp.f32 %v892_v48 }
 0x3da   :  { %v916_v55 = vpop.xlane.xlu0 %915 }
 0x3dd   :  { %v2910_v29 = vpop.eup %2909 }
 0x3de   :  { %v990_v57 = vmul.f32 %v2910_v29, %v3596_v6  ;;  %v3729_v47 = vpop.xlane.xlu1 %939  ;;  %v2912_v8 = vpop.eup %2911 }
 0x3df   :  { %v999_v62 = vmul.f32 %v2912_v8, %v3591_v27 }
 0x3e0   :  { %2433 = vmatprep.mubr.msk.f32.mxu0 %vm194_vm1, %v990_v57 }
 0x3e1   :  { %v2914_v2 = vpop.eup %2913  ;;  %2434 = vmatmul.mubr.msk.f32.gmra.mrb[10].mxu0 %vm194_vm1, %v991_v26 }
 0x3e2   :  { %v877_v13 = vpop.xlane.xlu0 %876  ;;  %v998_v42 = vmul.f32 %v2914_v2, %v3604_v40  ;;  %v3737_v33 = vpop.xlane.xlu1 %924 }
 0x3e3   :  { %2915 = vrcp.f32 %v877_v13 }
 0x3e4   :  { %2461 = vmatprep.mubr.msk.f32.mxu1 %vm194_vm1, %v998_v42 }
 0x3e5   :  { %2462 = vmatmul.mubr.msk.f32.gmra.mrb[10].mxu1 %vm194_vm1, %v999_v62 }
 0x3e6   :  { %v901_v6 = vpop.xlane.xlu0 %900 }
 0x3ea   :  { %v874_v36 = vpop.xlane.xlu1 %873  ;;  %v3740_v50 = vpop.xlane.xlu0 %948 }
 0x3eb   :  { %2917 = vrcp.f32 %v874_v36 }
 0x3ec   :  { %2919 = vrcp.f32 %v901_v6 }
 0x3ed   :  { %v2916_v40 = vpop.eup %2915 }
 0x3ee   :  { %v898_v18 = vpop.xlane.xlu1 %897  ;;  %v993_v63 = vmul.f32 %v2916_v40, %v3622_v56 }
 0x3ef   :  { %2921 = vrcp.f32 %v898_v18 }
 0x3f0   :  { %2923 = vrcp.f32 %v3706_v24 }
 0x3f2   :  { %v922_v37 = vpop.xlane.xlu0 %921  ;;  %v3742_v43 = vpop.xlane.xlu1 %930 }
 0x3f5   :  { %v2918_v27 = vpop.eup %2917 }
 0x3f6   :  { %v3744_v39 = vpop.xlane.xlu0 %945  ;;  %v3746_v45 = vpop.xlane.xlu1 %954  ;;  %v992_v51 = vmul.f32 %v2918_v27, %v3637_v10 }
 0x3f7   :  { %v2920_v3 = vpop.eup %2919 }
 0x3f8   :  { %2436 = vmatprep.mubr.msk.f32.mxu0 %vm194_vm1, %v992_v51  ;;  %v1001_v59 = vmul.f32 %v2920_v3, %v3630_v41 }
 0x3f9   :  { %v2922_v38 = vpop.eup %2921  ;;  %2437 = vmatmul.mubr.msk.f32.gmra.mrb[12].mxu0 %vm194_vm1, %v993_v63 }
 0x3fa   :  { %v883_v22 = vpop.xlane.xlu0 %882  ;;  %v2821_v19 = vpop.permute.xlu1 %2820  ;;  %v1000_v54 = vmul.f32 %v2922_v38, %v3646_v11 }
 0x3fb   :  { %v2823_v5 = vunpack.i.h.bf16 %v2821_v19  ;;  %v2822_v52 = vunpack.i.l.bf16 %v2821_v19  ;;  %2925 = vrcp.f32 %v883_v22  ;;  %v2924_v41 = vpop.eup %2923 }
 0x3fc   :  { %2464 = vmatprep.mubr.msk.f32.mxu1 %vm194_vm1, %v1000_v54  ;;  %v1004_v36 = vmul.f32 %v2924_v41, %v3565_v17 }
 0x3fd   :  { %v2677_v0 = vpack.c.bf16 %v2823_v5, %v2822_v52  ;;  %2465 = vmatmul.mubr.msk.f32.gmra.mrb[12].mxu1 %vm194_vm1, %v1001_v59 }
 0x3fe   :  { %v907_v10 = vpop.xlane.xlu0 %906  ;;  %v2826_v4 = vpop.permute.xlu1 %2825 }
 0x3ff   :  { %2678 = vmatprep.subr.bf16.mxu1 %v2677_v0  ;;  %v2828_v26 = vunpack.i.h.bf16 %v2826_v4  ;;  %v2827_v13 = vunpack.i.l.bf16 %v2826_v4 }
 0x400   :  { %2680 = vmatpush3.bf16.msra.mxu1 %v2677_v0 }
 0x401   :  { %v2665_v18 = vpack.c.bf16 %v2828_v26, %v2827_v13  ;;  %v1787_v26 = vld [vmem:[%s4003_s5 + $0x10] sm:$0xff] }
 0x402   :  { %v880_v56 = vpop.xlane.xlu0 %879 }
 0x403   :  { %2927 = vrcp.f32 %v880_v56 }
 0x404   :  { %2929 = vrcp.f32 %v3708_v25 }
 0x405   :  { %2931 = vrcp.f32 %v907_v10  ;;  %v2926_v29 = vpop.eup %2925 }
 0x406   :  { %v904_v11 = vpop.xlane.xlu0 %903  ;;  %v995_v25 = vmul.f32 %v2926_v29, %v3669_v60  ;;  %v1785_v29 = vld [vmem:[%s4003_s5] sm:$0xff] }
 0x407   :  { %2933 = vrcp.f32 %v904_v11 }
 0x408   :  { %2935 = vrcp.f32 %v3702_v32 }
 0x409   :  { %2937 = vrcp.f32 %v916_v55 }
 0x40a   :  { %v928_v48 = vpop.xlane.xlu0 %927  ;;  %2939 = vrcp.f32 %v3712_v21 }
 0x40b   :  { %2941 = vrcp.f32 %v922_v37 }
 0x40c   :  { %2943 = vrcp.f32 %v3737_v33 }
 0x40d   :  { %v2928_v57 = vpop.eup %2927  ;;  %2945 = vrcp.f32 %v928_v48 }
 0x40e   :  { %v2816_v8 = vpop.permute.xlu0 %2815  ;;  %v994_v24 = vmul.f32 %v2928_v57, %v3677_v23  ;;  %v2930_v2 = vpop.eup %2929  ;;  %2947 = vrcp.f32 %v3742_v43  ;;  %v1786_v57 = vld [vmem:[%s4003_s5 + $0x8] sm:$0xff] }
 0x40f   :  { %v2818_v42 = vunpack.i.h.bf16 %v2816_v8  ;;  %v2817_v62 = vunpack.i.l.bf16 %v2816_v8  ;;  %v2932_v6 = vpop.eup %2931  ;;  %v1012_v17 = vmul.f32 %v2930_v2, %v3574_v9  ;;  %2949 = vrcp.f32 %v3704_v35  ;;  %v1788_v2 = vld [vmem:[%s4003_s5 + $0x18] sm:$0xff] }
 0x410   :  { %2439 = vmatprep.mubr.msk.f32.mxu0 %vm194_vm1, %v994_v24  ;;  %v1003_v60 = vmul.f32 %v2932_v6, %v3673_v15  ;;  %2951 = vrcp.f32 %v3729_v47  ;;  %v2685_v24 = vpack.c.bf16 %v1786_v57, %v1785_v29  ;;  %v2220_v29 = vld [vmem:[%s4001_s3] ss:$0 sm:$0xff] }
 0x411   :  { %v2934_v32 = vpop.eup %2933  ;;  %v2661_v55 = vpack.c.bf16 %v2818_v42, %v2817_v62  ;;  %2440 = vmatmul.mubr.msk.f32.gmra.mrb[14].mxu0 %vm194_vm1, %v995_v25  ;;  %2953 = vrcp.f32 %v3723_v61  ;;  %v2689_v42 = vpack.c.bf16 %v1788_v2, %v1787_v26  ;;  %v1789_v62 = vld [vmem:[%s4003_s5 + $0x20] sm:$0xff]  ;;  %v1790_v25 = vld [vmem:[%s4003_s5 + $0x28] sm:$0xff] }
 0x412   :  { %2486 = vmatprep.mubr.msk.f32.mxu0 %vm194_vm1, %v1004_v36  ;;  %v1002_v23 = vmul.f32 %v2934_v32, %v3681_v12  ;;  %v2936_v21 = vpop.eup %2935  ;;  %2955 = vrcp.f32 %v3744_v39  ;;  %v2693_v36 = vpack.c.bf16 %v1790_v25, %v1789_v62 }
 0x413   :  { %2662 = vmatprep.subr.bf16.mxu0 %v2661_v55  ;;  %v2938_v37 = vpop.eup %2937  ;;  %v1005_v15 = vmul.f32 %v2936_v21, %v3547_v1  ;;  %2957 = vrcp.f32 %v3740_v50 }
 0x414   :  { %2467 = vmatprep.mubr.msk.f32.mxu1 %vm194_vm1, %v1002_v23  ;;  %2664 = vmatpush3.bf16.msra.mxu0 %v2661_v55  ;;  %v2940_v12 = vpop.eup %2939  ;;  %v1006_v33 = vmul.f32 %v2938_v37, %v3609_v34 }
 0x415   :  { %2468 = vmatmul.mubr.msk.f32.gmra.mrb[14].mxu1 %vm194_vm1, %v1003_v60  ;;  %2666 = vmatprep.subr.bf16.mxu0 %v2665_v18  ;;  %v2942_v40 = vpop.eup %2941  ;;  %v1007_v9 = vmul.f32 %v2940_v12, %v3569_v58  ;;  %v1791_v12 = vld [vmem:[%s4003_s5 + $0x30] sm:$0xff] }
 0x416   :  { %2514 = vmatprep.mubr.msk.f32.mxu1 %vm194_vm1, %v1012_v17  ;;  %v2944_v27 = vpop.eup %2943  ;;  %v1008_v51 = vmul.f32 %v2942_v40, %v3653_v53 }
 0x417   :  { %v2946_v3 = vpop.eup %2945  ;;  %v1009_v1 = vmul.f32 %v2944_v27, %v3619_v44 }
 0x418   :  { %2668 = vmatpush3.bf16.msra.mxu0 %v2665_v18  ;;  %v2948_v43 = vpop.eup %2947  ;;  %v1010_v34 = vmul.f32 %v2946_v3, %v3685_v31 }
 0x419   :  { %v1011_v63 = vmul.f32 %v2948_v43, %v3650_v7  ;;  %v2950_v22 = vpop.eup %2949  ;;  %2686 = vmatprep.subr.bf16.mxu0 %v2685_v24 }
 0x41a   :  { %v2952_v7 = vpop.eup %2951  ;;  %v1013_v35 = vmul.f32 %v2950_v22, %v3556_v30  ;;  %v3890_v22 = vld [vmem:[%s3999_s1 + $0x18] sm:$0xff] }
 0x41b   :  { %2487 = vmatmul.mubr.msk.f32.vlgmr.msra.gmra.mrb[16].mxu0 %vm194_vm1, %v1005_v15  ;;  %v2954_v47 = vpop.eup %2953  ;;  %v1014_v61 = vmul.f32 %v2952_v7, %v3614_v16  ;;  %v1762_v7 = vsel %vm194_vm1, %v3890_v22, 0.0 }
 0x41c   :  { %2489 = vmatprep.mubr.msk.f32.mxu0 %vm194_vm1, %v1006_v33  ;;  %v2956_v19 = vpop.eup %2955  ;;  %v1015_v50 = vmul.f32 %v2954_v47, %v3578_v14  ;;  %v3811_v14 = vld [vmem:[%s3999_s1] sm:$0xff]  ;;  %2688 = vmatpush3.bf16.msra.mxu0 %v2685_v24  ;;  %v1792_v33 = vld [vmem:[%s4003_s5 + $0x38] sm:$0xff] }
 0x41d   :  { %v2958_v39 = vpop.eup %2957  ;;  %v1016_v54 = vmul.f32 %v2956_v19, %v3662_v49  ;;  %2690 = vmatprep.subr.bf16.mxu0 %v2689_v42  ;;  %v2697_v40 = vpack.c.bf16 %v1792_v33, %v1791_v12 }
 0x41e   :  { %v1017_v30 = vmul.f32 %v2958_v39, %v3634_v46 }
 0x41f   :  { %2490 = vmatmul.mubr.msk.f32.gmra.mrb[18].mxu0 %vm194_vm1, %v1007_v9 }
 0x420   :  { %2492 = vmatprep.mubr.msk.f32.mxu0 %vm194_vm1, %v1008_v51  ;;  %2692 = vmatpush3.bf16.msra.mxu0 %v2689_v42 }
 0x421   :  { %2694 = vmatprep.subr.bf16.mxu0 %v2693_v36 }
 0x423   :  { %2493 = vmatmul.mubr.msk.f32.gmra.mrb[20].mxu0 %vm194_vm1, %v1009_v1 }
 0x424   :  { %2495 = vmatprep.mubr.msk.f32.mxu0 %vm194_vm1, %v1010_v34  ;;  %2696 = vmatpush3.bf16.msra.mxu0 %v2693_v36 }
 0x425   :  { %2698 = vmatprep.subr.bf16.mxu0 %v2697_v40 }
 0x427   :  { %2496 = vmatmul.mubr.msk.f32.gmra.mrb[22].mxu0 %vm194_vm1, %v1011_v63 }
 0x428   :  { %2700 = vmatpush3.bf16.msra.mxu0 %v2697_v40 }
 0x42f   :  { %v952_v58 = vpop.xlane.xlu1 %951 }
 0x430   :  { %2959 = vrcp.f32 %v952_v58  ;;  %v1753_v58 = vsel %vm194_vm1, %v3811_v14, 0.0 }
 0x431   :  { %2961 = vrcp.f32 %v3746_v45 }
 0x433   :  { %v2831_v44 = vpop.permute.xlu1 %2830 }
 0x434   :  { %v2833_v53 = vunpack.i.h.bf16 %v2831_v44  ;;  %v2832_v31 = vunpack.i.l.bf16 %v2831_v44  ;;  %v3876_v44 = vld [vmem:[%s3999_s1 + $0x8] sm:$0xff] }
 0x436   :  { %v2681_v38 = vpack.c.bf16 %v2833_v53, %v2832_v31  ;;  %v1756_v53 = vsel %vm194_vm1, %v3876_v44, 0.0  ;;  %v3883_v31 = vld [vmem:[%s3999_s1 + $0x10] sm:$0xff] }
 0x438   :  { %2682 = vmatprep.subr.bf16.mxu1 %v2681_v38 }
 0x439   :  { %2684 = vmatpush3.bf16.msra.mxu1 %v2681_v38  ;;  %v1759_v38 = vsel %vm194_vm1, %v3883_v31, 0.0 }
 0x43a   :  { %v2960_v5 = vpop.eup %2959 }
 0x43b   :  { %v2962_v45 = vpop.eup %2961  ;;  %v1018_v16 = vmul.f32 %v2960_v5, %v3696_v20 }
 0x43c   :  { %2515 = vmatmul.mubr.msk.f32.vlgmr.msra.gmra.mrb[16].mxu1 %vm194_vm1, %v1013_v35  ;;  %v1019_v52 = vmul.f32 %v2962_v45, %v3659_v28  ;;  %v3897_v35 = vld [vmem:[%s3999_s1 + $0x20] sm:$0xff] }
 0x43d   :  { %2517 = vmatprep.mubr.msk.f32.mxu1 %vm194_vm1, %v1014_v61  ;;  %v1765_v47 = vsel %vm194_vm1, %v3897_v35, 0.0  ;;  %v3904_v61 = vld [vmem:[%s3999_s1 + $0x28] sm:$0xff] }
 0x43e   :  { %v1768_v19 = vsel %vm194_vm1, %v3904_v61, 0.0 }
 0x440   :  { %2518 = vmatmul.mubr.msk.f32.gmra.mrb[18].mxu1 %vm194_vm1, %v1015_v50  ;;  %v3911_v50 = vld [vmem:[%s3999_s1 + $0x30] sm:$0xff] }
 0x441   :  { %2520 = vmatprep.mubr.msk.f32.mxu1 %vm194_vm1, %v1016_v54  ;;  %v1771_v39 = vsel %vm194_vm1, %v3911_v50, 0.0  ;;  %v3918_v54 = vld [vmem:[%s3999_s1 + $0x38] sm:$0xff] }
 0x442   :  { %v1774_v5 = vsel %vm194_vm1, %v3918_v54, 0.0 }
 0x444   :  { %2521 = vmatmul.mubr.msk.f32.gmra.mrb[20].mxu1 %vm194_vm1, %v1017_v30 }
 0x445   :  { %2523 = vmatprep.mubr.msk.f32.mxu1 %vm194_vm1, %v1018_v16 }
 0x448   :  { %2524 = vmatmul.mubr.msk.f32.gmra.mrb[22].mxu1 %vm194_vm1, %v1019_v52 }
 0x449   :  { %2570 = vmatprep.mubr.msk.f32.mxu1 %vm194_vm1, %v3811_v14 }
 0x4a0   :  { %v3815_v46 = vpop.f32.mrb[8].mxu0 }
 0x4a1   :  { %v3817_v49 = vpop.f32.mrb[9].mxu0 }
 0x4a4   :  { %v2460_v20 = vpop.f32.mrb[8].mxu1 }
 0x4a5   :  { %1618 = vrot.lane.b32.xlu1 %v2460_v20, %s3018_s14  ;;  %v1263_v59 = vpop.f32.mrb[9].mxu1 }
 0x4a9   :  { %1616 = vrot.lane.b32.xlu1 %v1263_v59, %s3018_s14 }
 0x4b4   :  { %v3821_v28 = vpop.f32.mrb[10].mxu0 }
 0x4b5   :  { %v3823_v0 = vpop.f32.mrb[11].mxu0 }
 0x4b8   :  { %v2463_v10 = vpop.f32.mrb[10].mxu1 }
 0x4b9   :  { %1622 = vrot.lane.b32.xlu1 %v2463_v10, %s3018_s14  ;;  %v1273_v56 = vpop.f32.mrb[11].mxu1 }
 0x4ba   :  { %1620 = vrot.lane.b32.xlu0 %v1273_v56, %s3018_s14 }
 0x4cc   :  { %v3827_v11 = vpop.f32.mrb[12].mxu0 }
 0x4cd   :  { %v3829_v48 = vpop.f32.mrb[13].mxu0 }
 0x4d0   :  { %v2466_v41 = vpop.f32.mrb[12].mxu1 }
 0x4d1   :  { %1626 = vrot.lane.b32.xlu1 %v2466_v41, %s3018_s14  ;;  %v1283_v4 = vpop.f32.mrb[13].mxu1 }
 0x4d2   :  { %1624 = vrot.lane.b32.xlu0 %v1283_v4, %s3018_s14 }
 0x4e4   :  { %v3842_v8 = vpop.f32.mrb[14].mxu0 }
 0x4e5   :  { %v3847_v13 = vpop.f32.mrb[15].mxu0 }
 0x4e8   :  { %v2469_v6 = vpop.f32.mrb[14].mxu1 }
 0x4e9   :  { %1630 = vrot.lane.b32.xlu1 %v2469_v6, %s3018_s14  ;;  %v1293_v32 = vpop.f32.mrb[15].mxu1 }
 0x4ea   :  { %1628 = vrot.lane.b32.xlu0 %v1293_v32, %s3018_s14 }
 0x4ee   :  { %v2488_v55 = vpop.f32.mrb[16].mxu0 }
 0x4ef   :  { %1650 = vrot.lane.b32.xlu1 %v2488_v55, %s3019_s24  ;;  %v1416_v23 = vpop.f32.mrb[17].mxu0 }
 0x4f0   :  { %1648 = vrot.lane.b32.xlu0 %v1416_v23, %s3019_s24 }
 0x4f2   :  { %v2491_v18 = vpop.f32.mrb[18].mxu0 }
 0x4f3   :  { %v1426_v60 = vpop.f32.mrb[19].mxu0 }
 0x4f6   :  { %v2494_v17 = vpop.f32.mrb[20].mxu0 }
 0x4f7   :  { %v1436_v21 = vpop.f32.mrb[21].mxu0 }
 0x4fa   :  { %v2497_v37 = vpop.f32.mrb[22].mxu0 }
 0x4fb   :  { %v1446_v15 = vpop.f32.mrb[23].mxu0 }
 0x50f   :  { %v2516_v9 = vpop.f32.mrb[16].mxu1 }
 0x510   :  { %1682 = vrot.lane.b32.xlu1 %v2516_v9, %s3020_s29  ;;  %v1569_v27 = vpop.f32.mrb[17].mxu1 }
 0x511   :  { %1680 = vrot.lane.b32.xlu0 %v1569_v27, %s3020_s29 }
 0x513   :  { %v2519_v51 = vpop.f32.mrb[18].mxu1 }
 0x514   :  { %1654 = vrot.lane.b32.xlu1 %v2491_v18, %s3019_s24  ;;  %v1579_v3 = vpop.f32.mrb[19].mxu1 }
 0x515   :  { %1652 = vrot.lane.b32.xlu0 %v1426_v60, %s3019_s24 }
 0x517   :  { %v2522_v1 = vpop.f32.mrb[20].mxu1  ;;  %v1619_v30 = vpop.permute.xlu1 %1618 }
 0x518   :  { %1686 = vrot.lane.b32.xlu1 %v2519_v51, %s3020_s29  ;;  %v1589_v43 = vpop.f32.mrb[21].mxu1  ;;  %v1705_v4 = vsel %vm56_vm0, %v3815_v46, %v1619_v30 }
 0x519   :  { %1684 = vrot.lane.b32.xlu0 %v1579_v3, %s3020_s29 }
 0x51b   :  { %v2525_v34 = vpop.f32.mrb[22].mxu1  ;;  %v1617_v45 = vpop.permute.xlu1 %1616 }
 0x51c   :  { %1658 = vrot.lane.b32.xlu1 %v2494_v17, %s3019_s24  ;;  %v1599_v63 = vpop.f32.mrb[23].mxu1  ;;  %v1704_v57 = vsel %vm56_vm0, %v3817_v49, %v1617_v45 }
 0x51d   :  { %1656 = vrot.lane.b32.xlu0 %v1436_v21, %s3019_s24 }
 0x520   :  { %1690 = vrot.lane.b32.xlu1 %v2522_v1, %s3020_s29 }
 0x521   :  { %1688 = vrot.lane.b32.xlu0 %v1589_v43, %s3020_s29 }
 0x524   :  { %1662 = vrot.lane.b32.xlu1 %v2497_v37, %s3019_s24 }
 0x525   :  { %1660 = vrot.lane.b32.xlu0 %v1446_v15, %s3019_s24 }
 0x528   :  { %1694 = vrot.lane.b32.xlu1 %v2525_v34, %s3020_s29 }
 0x529   :  { %1692 = vrot.lane.b32.xlu0 %v1599_v63, %s3020_s29 }
 0x52b   :  { %v1623_v16 = vpop.permute.xlu1 %1622 }
 0x52c   :  { %v1621_v52 = vpop.permute.xlu0 %1620  ;;  %v1707_v18 = vsel %vm56_vm0, %v3821_v28, %v1623_v16 }
 0x52d   :  { %v1706_v49 = vsel %vm56_vm0, %v3823_v0, %v1621_v52 }
 0x543   :  { %v1627_v14 = vpop.permute.xlu1 %1626 }
 0x544   :  { %v1625_v20 = vpop.permute.xlu0 %1624  ;;  %v1709_v0 = vsel %vm56_vm0, %v3827_v11, %v1627_v14 }
 0x545   :  { %v1708_v3 = vsel %vm56_vm0, %v3829_v48, %v1625_v20 }
 0x548   :  { %1754 = vadd.xlane.f32.xlu0 %v1753_v58 }
 0x54c   :  { %1757 = vadd.xlane.f32.xlu1 %v1756_v53  ;;  %1760 = vadd.xlane.f32.xlu0 %v1759_v38 }
 0x550   :  { %1763 = vadd.xlane.f32.xlu0 %v1762_v7  ;;  %1766 = vadd.xlane.f32.xlu1 %v1765_v47 }
 0x554   :  { %1769 = vadd.xlane.f32.xlu0 %v1768_v19  ;;  %1772 = vadd.xlane.f32.xlu1 %v1771_v39 }
 0x558   :  { %1775 = vadd.xlane.f32.xlu0 %v1774_v5 }
 0x55b   :  { %v1631_v59 = vpop.permute.xlu1 %1630 }
 0x55c   :  { %v1629_v10 = vpop.permute.xlu0 %1628  ;;  %v1711_v48 = vsel %vm56_vm0, %v3842_v8, %v1631_v59 }
 0x55d   :  { %v1710_v5 = vsel %vm56_vm0, %v3847_v13, %v1629_v10  ;;  %vm3022_vm0 = vmmov 0  }
 0x561   :  { %v1651_v56 = vpop.permute.xlu1 %1650 }
 0x562   :  { %v1649_v41 = vpop.permute.xlu0 %1648  ;;  %v1714_v26 = vsel %vm1712_vm14, %v1705_v4, %v1651_v56 }
 0x563   :  { %v1713_v2 = vsel %vm1712_vm14, %v1704_v57, %v1649_v41 }
 0x582   :  { %v1683_v24 = vpop.permute.xlu1 %1682 }
 0x583   :  { %v1723_v42 = vsel %vm1721_vm15, %v1714_v26, %v1683_v24  ;;  %v1681_v62 = vpop.permute.xlu0 %1680 }
 0x584   :  { %v1738_v25 = vadd.f32 %v2220_v29, %v1723_v42  ;;  %v1722_v6 = vsel %vm1721_vm15, %v1713_v2, %v1681_v62 }
 0x585   :  { %v1737_v36 = vadd.f32 %v2220_v29, %v1722_v6 }
 0x586   :  { %v1655_v46 = vpop.permute.xlu1 %1654  ;;  %v1746_v23 = vmax.f32 %v1738_v25, 0.0 }
 0x587   :  { %v1745_v32 = vmax.f32 %v1737_v36, 0.0  ;;  %v1653_v55 = vpop.permute.xlu0 %1652  ;;  %v1716_v60 = vsel %vm1712_vm14, %v1707_v18, %v1655_v46 }
 0x588   :  { %v1715_v21 = vsel %vm1712_vm14, %v1706_v49, %v1653_v55 }
 0x589   :  { %2542 = vmatprep.mubr.msk.f32.mxu0 %vm194_vm1, %v1745_v32 }
 0x58a   :  { %2543 = vmatmul.mubr.msk.f32.vlgmr.msra.gmra.mrb[24].mxu0 %vm194_vm1, %v1746_v23  ;;  %v1687_v17 = vpop.permute.xlu1 %1686 }
 0x58b   :  { %v1725_v37 = vsel %vm1721_vm15, %v1716_v60, %v1687_v17  ;;  %v1685_v15 = vpop.permute.xlu0 %1684 }
 0x58c   :  { %v1740_v12 = vadd.f32 %v2220_v29, %v1725_v37  ;;  %v1724_v33 = vsel %vm1721_vm15, %v1715_v21, %v1685_v15 }
 0x58d   :  { %v1739_v40 = vadd.f32 %v2220_v29, %v1724_v33 }
 0x58e   :  { %v1659_v28 = vpop.permute.xlu1 %1658  ;;  %v1748_v51 = vmax.f32 %v1740_v12, 0.0 }
 0x58f   :  { %v1747_v9 = vmax.f32 %v1739_v40, 0.0  ;;  %v1657_v27 = vpop.permute.xlu0 %1656  ;;  %v1718_v1 = vsel %vm1712_vm14, %v1709_v0, %v1659_v28 }
 0x590   :  { %v1717_v34 = vsel %vm1712_vm14, %v1708_v3, %v1657_v27 }
 0x591   :  { %2545 = vmatprep.mubr.msk.f32.mxu0 %vm194_vm1, %v1747_v9 }
 0x592   :  { %2546 = vmatmul.mubr.msk.f32.gmra.mrb[26].mxu0 %vm194_vm1, %v1748_v51  ;;  %v1691_v43 = vpop.permute.xlu1 %1690 }
 0x593   :  { %v1727_v63 = vsel %vm1721_vm15, %v1718_v1, %v1691_v43  ;;  %v1689_v58 = vpop.permute.xlu0 %1688 }
 0x594   :  { %v1742_v53 = vadd.f32 %v2220_v29, %v1727_v63  ;;  %v1726_v38 = vsel %vm1721_vm15, %v1717_v34, %v1689_v58  ;;  %v3021_v63 = vmov 0.0|0.0  }
 0x595   :  { %v1741_v7 = vadd.f32 %v2220_v29, %v1726_v38  ;;  %2717 = vmatprep.subr.bf16.mxu0 %v3021_v63 }
 0x596   :  { %v1663_v11 = vpop.permute.xlu1 %1662  ;;  %v1750_v39 = vmax.f32 %v1742_v53, 0.0 }
 0x597   :  { %v1749_v47 = vmax.f32 %v1741_v7, 0.0  ;;  %v1661_v19 = vpop.permute.xlu0 %1660  ;;  %v1720_v30 = vsel %vm1712_vm14, %v1711_v48, %v1663_v11 }
 0x598   :  { %v1719_v16 = vsel %vm1712_vm14, %v1710_v5, %v1661_v19 }
 0x599   :  { %2548 = vmatprep.mubr.msk.f32.mxu0 %vm194_vm1, %v1749_v47 }
 0x59a   :  { %2549 = vmatmul.mubr.msk.f32.gmra.mrb[28].mxu0 %vm194_vm1, %v1750_v39  ;;  %v1695_v45 = vpop.permute.xlu1 %1694 }
 0x59b   :  { %v1729_v52 = vsel %vm1721_vm15, %v1720_v30, %v1695_v45  ;;  %v1693_v14 = vpop.permute.xlu0 %1692 }
 0x59c   :  { %v1744_v20 = vadd.f32 %v2220_v29, %v1729_v52  ;;  %v1728_v56 = vsel %vm1721_vm15, %v1719_v16, %v1693_v14 }
 0x59d   :  { %v1743_v41 = vadd.f32 %v2220_v29, %v1728_v56 }
 0x59e   :  { %v1752_v59 = vmax.f32 %v1744_v20, 0.0 }
 0x59f   :  { %v1751_v8 = vmax.f32 %v1743_v41, 0.0 }
 0x5a1   :  { %2551 = vmatprep.mubr.msk.f32.mxu0 %vm194_vm1, %v1751_v8 }
 0x5a2   :  { %2552 = vmatmul.mubr.msk.f32.gmra.mrb[30].mxu0 %vm194_vm1, %v1752_v59 }
 0x5d5   :  { %v1755_v13 = vpop.xlane.xlu0 %1754 }
 0x5d9   :  { %v1758_v10 = vpop.xlane.xlu1 %1757  ;;  %v1761_v4 = vpop.xlane.xlu0 %1760 }
 0x5da   :  { %2963 = vrsqrt.f32 %v1758_v10 }
 0x5db   :  { %2965 = vrsqrt.f32 %v1755_v13 }
 0x5dd   :  { %v1764_v57 = vpop.xlane.xlu0 %1763  ;;  %v1767_v6 = vpop.xlane.xlu1 %1766 }
 0x5de   :  { %2967 = vrsqrt.f32 %v1764_v57  ;;  %v2082_v57 = vld [vmem:[%s4005_s7] sm:$0x3] }
 0x5df   :  { %2969 = vrsqrt.f32 %v1761_v4 }
 0x5e1   :  { %v1770_v29 = vpop.xlane.xlu0 %1769  ;;  %v1773_v17 = vpop.xlane.xlu1 %1772 }
 0x5e2   :  { %2971 = vrsqrt.f32 %v1770_v29 }
 0x5e3   :  { %2973 = vrsqrt.f32 %v1767_v6 }
 0x5e4   :  { %v2964_v26 = vpop.eup %2963 }
 0x5e5   :  { %v2966_v24 = vpop.eup %2965  ;;  %v1776_v49 = vpop.xlane.xlu0 %1775 }
 0x5e6   :  { %2975 = vrsqrt.f32 %v1776_v49 }
 0x5e7   :  { %2977 = vrsqrt.f32 %v1773_v17 }
 0x5e8   :  { %v2968_v46 = vpop.eup %2967 }
 0x5e9   :  { %v2970_v32 = vpop.eup %2969 }
 0x5ec   :  { %v2972_v37 = vpop.eup %2971 }
 0x5ed   :  { %v2974_v15 = vpop.eup %2973 }
 0x5f0   :  { %v2976_v27 = vpop.eup %2975 }
 0x5f1   :  { %v2978_v51 = vpop.eup %2977 }
 0x65d   :  { %v2544_v2 = vpop.f32.mrb[24].mxu0 }
 0x65e   :  { %v1923_v42 = vmul.f32 %v2964_v26, %v2544_v2  ;;  %v1883_v62 = vpop.f32.mrb[25].mxu0 }
 0x65f   :  { %v1922_v25 = vmul.f32 %v2966_v24, %v1883_v62 }
 0x661   :  { %v2701_v36 = vpack.c.bf16 %v1923_v42, %v1922_v25 }
 0x663   :  { %2702 = vmatprep.subr.bf16.mxu1 %v2701_v36 }
 0x664   :  { %2704 = vmatpush3.bf16.msra.mxu1 %v2701_v36 }
 0x665   :  { %v2547_v55 = vpop.f32.mrb[26].mxu0 }
 0x666   :  { %v1925_v23 = vmul.f32 %v2968_v46, %v2547_v55  ;;  %v1893_v18 = vpop.f32.mrb[27].mxu0 }
 0x667   :  { %v1924_v60 = vmul.f32 %v2970_v32, %v1893_v18 }
 0x669   :  { %v2705_v21 = vpack.c.bf16 %v1925_v23, %v1924_v60 }
 0x66b   :  { %2706 = vmatprep.subr.bf16.mxu1 %v2705_v21 }
 0x66c   :  { %2708 = vmatpush3.bf16.msra.mxu1 %v2705_v21 }
 0x66d   :  { %v2550_v12 = vpop.f32.mrb[28].mxu0 }
 0x66e   :  { %v1927_v33 = vmul.f32 %v2972_v37, %v2550_v12  ;;  %v1903_v40 = vpop.f32.mrb[29].mxu0 }
 0x66f   :  { %v1926_v28 = vmul.f32 %v2974_v15, %v1903_v40 }
 0x671   :  { %v2709_v9 = vpack.c.bf16 %v1927_v33, %v1926_v28 }
 0x673   :  { %2710 = vmatprep.subr.bf16.mxu1 %v2709_v9 }
 0x674   :  { %2712 = vmatpush3.bf16.msra.mxu1 %v2709_v9 }
 0x675   :  { %v2553_v0 = vpop.f32.mrb[30].mxu0 }
 0x676   :  { %v1929_v3 = vmul.f32 %v2976_v27, %v2553_v0  ;;  %v1913_v1 = vpop.f32.mrb[31].mxu0 }
 0x677   :  { %v1928_v43 = vmul.f32 %v2978_v51, %v1913_v1 }
 0x679   :  { %v2713_v34 = vpack.c.bf16 %v1929_v3, %v1928_v43 }
 0x67b   :  { %2714 = vmatprep.subr.bf16.mxu1 %v2713_v34 }
 0x67c   :  { %2716 = vmatpush3.bf16.msra.mxu1 %v2713_v34 }
 0x67f   :  { %2571 = vmatmul.mubr.msk.f32.vlgmr.msra.gmra.mrb[24].mxu1 %vm194_vm1, %v3876_v44  ;;  %v3023_v44 = vmov 0.0  }
 0x680   :  { %2573 = vmatprep.mubr.msk.f32.mxu1 %vm194_vm1, %v3883_v31  ;;  %2598 = vmatprep.mubr.msk.f32.mxu0 %vm3022_vm0, %v3023_v44 }
 0x683   :  { %2574 = vmatmul.mubr.msk.f32.gmra.mrb[26].mxu1 %vm194_vm1, %v3890_v22  ;;  %v2237_v22 = vld [vmem:[%s4004_s6] ss:$0 sm:$0xff] }
 0x684   :  { %2576 = vmatprep.mubr.msk.f32.mxu1 %vm194_vm1, %v3897_v35 }
 0x687   :  { %2577 = vmatmul.mubr.msk.f32.gmra.mrb[28].mxu1 %vm194_vm1, %v3904_v61 }
 0x688   :  { %2579 = vmatprep.mubr.msk.f32.mxu1 %vm194_vm1, %v3911_v50 }
 0x68b   :  { %2580 = vmatmul.mubr.msk.f32.gmra.mrb[30].mxu1 %vm194_vm1, %v3918_v54 }
 0x752   :  { %v2572_v31 = vpop.f32.mrb[24].mxu1 }
 0x753   :  { %v2060_v35 = vmul.f32 %v2964_v26, %v2572_v31  ;;  %v2020_v58 = vpop.f32.mrb[25].mxu1 }
 0x754   :  { %v2059_v53 = vmul.f32 %v2966_v24, %v2020_v58 }
 0x755   :  { %v2075_v61 = vadd.f32 %v2237_v22, %v2060_v35 }
 0x756   :  { %v2074_v38 = vadd.f32 %v2237_v22, %v2059_v53  ;;  %v2575_v7 = vpop.f32.mrb[26].mxu1 }
 0x757   :  { %v2062_v50 = vmul.f32 %v2968_v46, %v2575_v7  ;;  %v2030_v11 = vpop.f32.mrb[27].mxu1 }
 0x758   :  { %v2718_v47 = vpack.c.bf16 %v2075_v61, %v2074_v38  ;;  %v2061_v54 = vmul.f32 %v2970_v32, %v2030_v11 }
 0x759   :  { %v2077_v19 = vadd.f32 %v2237_v22, %v2062_v50 }
 0x75a   :  { %v2076_v39 = vadd.f32 %v2237_v22, %v2061_v54  ;;  %v2578_v48 = vpop.f32.mrb[28].mxu1  ;;  %2719 = vmatpush3.bf16.msra.mxu0 %v2718_v47 }
 0x75b   :  { %v2064_v5 = vmul.f32 %v2972_v37, %v2578_v48  ;;  %v2040_v30 = vpop.f32.mrb[29].mxu1  ;;  %2720 = vmatprep.subr.bf16.mxu0 %v3021_v63 }
 0x75c   :  { %v2721_v45 = vpack.c.bf16 %v2077_v19, %v2076_v39  ;;  %v2063_v16 = vmul.f32 %v2974_v15, %v2040_v30 }
 0x75d   :  { %v2079_v52 = vadd.f32 %v2237_v22, %v2064_v5 }
 0x75e   :  { %v2078_v14 = vadd.f32 %v2237_v22, %v2063_v16  ;;  %v2581_v20 = vpop.f32.mrb[30].mxu1  ;;  %2722 = vmatpush3.bf16.msra.mxu0 %v2721_v45 }
 0x75f   :  { %v2066_v56 = vmul.f32 %v2976_v27, %v2581_v20  ;;  %v2050_v41 = vpop.f32.mrb[31].mxu1  ;;  %2723 = vmatprep.subr.bf16.mxu0 %v3021_v63 }
 0x760   :  { %v2724_v8 = vpack.c.bf16 %v2079_v52, %v2078_v14  ;;  %v2065_v59 = vmul.f32 %v2978_v51, %v2050_v41 }
 0x761   :  { %v2081_v13 = vadd.f32 %v2237_v22, %v2066_v56 }
 0x762   :  { %v2080_v10 = vadd.f32 %v2237_v22, %v2065_v59  ;;  %2725 = vmatpush3.bf16.msra.mxu0 %v2724_v8 }
 0x763   :  { %2726 = vmatprep.subr.bf16.mxu0 %v3021_v63 }
 0x764   :  { %v2727_v4 = vpack.c.bf16 %v2081_v13, %v2080_v10 }
 0x766   :  { %2728 = vmatpush3.bf16.msra.mxu0 %v2727_v4 }
 0x769   :  { %2599 = vmatmul.mubr.msk.f32.vlgmr.msra.gmra.mrb[32].mxu0 %vm194_vm1, %v2082_v57 }
 0x83c   :  { %v2152_v26 = vpop.f32.mrb[32].mxu0 }
 0x83d   :  { %2157 = vst.msk [vmem:[#allocation2] sm:$0x3] %vm2156_vm2, %v2152_v26  ;;  %v2600_v24 = vpop.f32.mrb[33].mxu0 }
 0x83e   :  { %2998 = shalt.err (!%p2995_p4)
}
 0x83f   :  { %s2999_s7 = scalar_lea.hbm %s4006_s8, 32 }
 0x840   :  { %p3000_p5 = scmp.ne.s32.totalorder %s4006_s8, %s2999_s7  ;;  %p3003_p6 = scmp.lt.u32.totalorder %s2999_s7, %s4006_s8 }
 0x842   :  { %p3005_p7 = pnand %p3003_p6, %p3000_p5 }
 0x844   :  { %3008 = shalt.err (!%p3005_p7)
}
 0x845   :  { %2167 = dma.vmem_to_hbm [thread:$0]  %s2165_s22, 32, %s4006_s8, [#allocation3]  }
 0x846   :  { %3009 = dma.done.wait [#allocation3], 32  }
 0x847   :  { %3010 = vsyncadd [#allocation3], 4294967264 }
 0x848   :  { %2171 = vsyncpa [#allocation3], 1 }

</bundles_post_ra>
